<compile_context>
chip_gen: v7x
topology: tpu7x:2x2x1
jax: 0.10.0
libtpu: 0.0.40
codegen_flags: <defaults>
</compile_context>

<pallas_src>
import jax
import jax.numpy as jnp
from jax.experimental import pallas as pl
from jax.experimental.pallas import tpu as pltpu

INPUT_SIZE = 2
HIDDEN_SIZE = 4
OUTPUT_SIZE = 1
NUM_LAYERS = 2


# ----------------------------------------------------------------------------- kernel
def _lstm_kernel(x_ref,        # (S, B, I)
                 w_ih0_ref,    # (I, 4H)   gate order (i, f, o, g)
                 b0_ref,       # (1, 4H)   b_ih_l0 + b_hh_l0, reordered
                 w_rec_ref,    # (2H+1, 8H) block-diag [W_hh0 | W_hh1], last row = [0 | b1]
                 w_ih1_ref,    # (H, 4H)
                 w_lin_ref,    # (H, O)
                 b_lin_ref,    # (1, O)
                 out_ref):     # (S, B, O)
    S, B, I = x_ref.shape
    H = HIDDEN_SIZE

    w_ih0 = w_ih0_ref[...]
    b0 = b0_ref[...]
    w_rec = w_rec_ref[...]
    w_ih1 = w_ih1_ref[...]
    w_lin = w_lin_ref[...]
    b_lin = b_lin_ref[...]

    # --- hoisted layer-0 input projection (off the serial critical path) ---
    x_flat = x_ref[...].reshape(S * B, I)
    xproj = (jnp.dot(x_flat, w_ih0, preferred_element_type=jnp.float32)
             + b0).reshape(S, B, 4 * H)                       # (S, B, 4H), bias folded once

    def activate(gates, c):
        # gate layout: [i | f | o | g] -> one sigmoid over 3H lanes, one tanh over H lanes
        sig = jax.nn.sigmoid(gates[:, :3 * H])
        i_g = sig[:, 0:H]
        f_g = sig[:, H:2 * H]
        o_g = sig[:, 2 * H:3 * H]
        g_g = jnp.tanh(gates[:, 3 * H:4 * H])
        c_new = f_g * c + i_g * g_g
        h_new = o_g * jnp.tanh(c_new)
        return h_new, c_new

    ones_col = jnp.ones((B, 1), jnp.float32)                  # hoisted (folds b1 via w_rec)
    h0 = c0 = h1 = c1 = jnp.zeros((B, H), jnp.float32)
    h1_all = []

    # S is static and small -> fully unrolled loop (static indexing, cross-step overlap).
    for t in range(S):
        # One fused block-diagonal recurrent dot for both layers (+ b1 via the ones row).
        zcat = jnp.concatenate([h0, h1, ones_col], axis=-1)   # (B, 2H+1)
        rec = jnp.dot(zcat, w_rec, preferred_element_type=jnp.float32)   # (B, 8H)

        # LSTM layer 0
        gates0 = xproj[t] + rec[:, :4 * H]
        h0, c0 = activate(gates0, c0)

        # LSTM layer 1 (input = h0 of the same step)
        gates1 = jnp.dot(h0, w_ih1, preferred_element_type=jnp.float32) + rec[:, 4 * H:]
        h1, c1 = activate(gates1, c1)
        h1_all.append(h1)

    # --- hoisted output Linear projection + single store ---
    h1_stack = jnp.stack(h1_all, axis=0).reshape(S * B, H)    # (S*B, H)
    y = jnp.dot(h1_stack, w_lin, preferred_element_type=jnp.float32) + b_lin
    out_ref[...] = y.reshape(S, B, OUTPUT_SIZE).astype(out_ref.dtype)


# ----------------------------------------------------------------------------- wrapper
def lstm_pallas(x, params):
    """x: (S, B, INPUT_SIZE) float32; params from prepare_params(); returns (S, B, OUTPUT_SIZE)."""
    S, B, _ = x.shape
    args = (x,) + tuple(params)
    vmem_spec = pl.BlockSpec(memory_space=pltpu.MemorySpace.VMEM)
    return pl.pallas_call(
        _lstm_kernel,
        out_shape=jax.ShapeDtypeStruct((S, B, OUTPUT_SIZE), jnp.float32),
        in_specs=[vmem_spec] * len(args),
        out_specs=vmem_spec,
    )(*args)


# ----------------------------------------------------------------------------- params
def init_params(key):
    """PyTorch-layout raw params, uniform(-1/sqrt(H), 1/sqrt(H)), gate order (i, f, g, o)."""
    H, I, O = HIDDEN_SIZE, INPUT_SIZE, OUTPUT_SIZE
    bound = 1.0 / jnp.sqrt(jnp.float32(H))
    keys = jax.random.split(key, 10)
    u = lambda kk, shape: jax.random.uniform(kk, shape, jnp.float32, -bound, bound)
    return (u(keys[0], (4 * H, I)),   # w_ih_l0
            u(keys[1], (4 * H, H)),   # w_hh_l0
            u(keys[2], (4 * H,)),     # b_ih_l0
            u(keys[3], (4 * H,)),     # b_hh_l0
            u(keys[4], (4 * H, H)),   # w_ih_l1
            u(keys[5], (4 * H, H)),   # w_hh_l1
            u(keys[6], (4 * H,)),     # b_ih_l1
            u(keys[7], (4 * H,)),     # b_hh_l1
            u(keys[8], (O, H)),       # w_lin
            u(keys[9], (O,)))         # b_lin


def prepare_params(raw):
    """Host-side weight fusion / reordering for the kernel layout."""
    (w_ih_l0, w_hh_l0, b_ih_l0, b_hh_l0,
     w_ih_l1, w_hh_l1, b_ih_l1, b_hh_l1, w_lin, b_lin) = raw
    H = HIDDEN_SIZE
    # PyTorch gate rows (i, f, g, o) -> kernel order (i, f, o, g)
    perm = jnp.concatenate([jnp.arange(0, 2 * H),
                            jnp.arange(3 * H, 4 * H),
                            jnp.arange(2 * H, 3 * H)])

    reorder_t = lambda w: w[perm, :].T         # (4H, K) -> (K, 4H), columns in (i,f,o,g) order
    w_ih0_t = reorder_t(w_ih_l0)               # (I, 4H)
    w_hh0_t = reorder_t(w_hh_l0)               # (H, 4H)
    w_ih1_t = reorder_t(w_ih_l1)               # (H, 4H)
    w_hh1_t = reorder_t(w_hh_l1)               # (H, 4H)
    b0 = (b_ih_l0 + b_hh_l0)[perm][None, :]    # (1, 4H)
    b1 = (b_ih_l1 + b_hh_l1)[perm]             # (4H,)

    # Block-diagonal recurrent weight: [h0 | h1 | 1] @ w_rec = [h0@W_hh0^T | h1@W_hh1^T + b1]
    w_rec = jnp.zeros((2 * H + 1, 8 * H), jnp.float32)
    w_rec = w_rec.at[:H, :4 * H].set(w_hh0_t)
    w_rec = w_rec.at[H:2 * H, 4 * H:].set(w_hh1_t)
    w_rec = w_rec.at[2 * H, 4 * H:].set(b1)

    return (w_ih0_t, b0, w_rec, w_ih1_t, w_lin.T, b_lin[None, :])


# ----------------------------------------------------------------------------- reference
def lstm_ref(x, raw):
    """Pure-JAX reference reproducing PyTorch nn.LSTM(2 layers) + nn.Linear semantics."""
    (w_ih_l0, w_hh_l0, b_ih_l0, b_hh_l0,
     w_ih_l1, w_hh_l1, b_ih_l1, b_hh_l1, w_lin, b_lin) = raw
    S, B, _ = x.shape
    H = HIDDEN_SIZE

    def cell(x_t, h, c, w_ih, w_hh, b_ih, b_hh):
        gates = x_t @ w_ih.T + h @ w_hh.T + b_ih + b_hh
        i = jax.nn.sigmoid(gates[:, 0:H])
        f = jax.nn.sigmoid(gates[:, H:2 * H])
        g = jnp.tanh(gates[:, 2 * H:3 * H])
        o = jax.nn.sigmoid(gates[:, 3 * H:4 * H])
        c_new = f * c + i * g
        return o * jnp.tanh(c_new), c_new

    h0 = c0 = h1 = c1 = jnp.zeros((B, H), jnp.float32)
    outs = []
    for t in range(S):
        h0, c0 = cell(x[t], h0, c0, w_ih_l0, w_hh_l0, b_ih_l0, b_hh_l0)
        h1, c1 = cell(h0, h1, c1, w_ih_l1, w_hh_l1, b_ih_l1, b_hh_l1)
        outs.append(h1 @ w_lin.T + b_lin)
    return jnp.stack(outs, axis=0)


if __name__ == "__main__":
    key = jax.random.PRNGKey(0)
    k_x, k_p = jax.random.split(key)

    SEQ, BATCH = 8, 2
    x = jax.random.normal(k_x, (SEQ, BATCH, INPUT_SIZE), dtype=jnp.float32)
    raw_params = init_params(k_p)
    params = prepare_params(raw_params)

    out = lstm_pallas(x, params)
    out = jax.block_until_ready(out)

    ref = lstm_ref(x, raw_params)
    assert out.shape == (SEQ, BATCH, OUTPUT_SIZE)
    assert jnp.allclose(out, ref, atol=1e-5, rtol=1e-5), "Pallas output mismatch vs reference"

    # TODO(synk): argparse epoch handling and torch.save/torch.load (.pkl) are I/O-only,
    # not part of the forward pass, so they are intentionally not translated.
    print("KERNEL_OK")
</pallas_src>

<mosaic_0001>
module attributes {stable_mosaic.version = 11 : i64} {
  func.func @_lstm_kernel(%arg0: memref<8x2x2xf32, #tpu.memory_space<vmem>>, %arg1: memref<2x16xf32, #tpu.memory_space<vmem>>, %arg2: memref<1x16xf32, #tpu.memory_space<vmem>>, %arg3: memref<9x32xf32, #tpu.memory_space<vmem>>, %arg4: memref<4x16xf32, #tpu.memory_space<vmem>>, %arg5: memref<4x1xf32, #tpu.memory_space<vmem>>, %arg6: memref<1x1xf32, #tpu.memory_space<vmem>>, %arg7: memref<8x2x1xf32, #tpu.memory_space<vmem>>) attributes {dimension_semantics = [], scalar_prefetch = 0 : i64, scratch_operands = 0 : i64, tpu.core_type = #tpu.core_type<tc>} {
    %c0 = arith.constant 0 : index
    %c0_0 = arith.constant 0 : index
    %0 = vector.load %arg1[%c0, %c0_0] : memref<2x16xf32, #tpu.memory_space<vmem>>, vector<2x16xf32>
    %c0_1 = arith.constant 0 : index
    %c0_2 = arith.constant 0 : index
    %1 = vector.load %arg2[%c0_1, %c0_2] : memref<1x16xf32, #tpu.memory_space<vmem>>, vector<1x16xf32>
    %c0_3 = arith.constant 0 : index
    %c0_4 = arith.constant 0 : index
    %2 = vector.load %arg3[%c0_3, %c0_4] : memref<9x32xf32, #tpu.memory_space<vmem>>, vector<9x32xf32>
    %c0_5 = arith.constant 0 : index
    %c0_6 = arith.constant 0 : index
    %3 = vector.load %arg4[%c0_5, %c0_6] : memref<4x16xf32, #tpu.memory_space<vmem>>, vector<4x16xf32>
    %c0_7 = arith.constant 0 : index
    %c0_8 = arith.constant 0 : index
    %4 = vector.load %arg5[%c0_7, %c0_8] : memref<4x1xf32, #tpu.memory_space<vmem>>, vector<4x1xf32>
    %c0_9 = arith.constant 0 : index
    %c0_10 = arith.constant 0 : index
    %5 = vector.load %arg6[%c0_9, %c0_10] : memref<1x1xf32, #tpu.memory_space<vmem>>, vector<1x1xf32>
    %c0_11 = arith.constant 0 : index
    %c0_12 = arith.constant 0 : index
    %c0_13 = arith.constant 0 : index
    %6 = vector.load %arg0[%c0_11, %c0_12, %c0_13] : memref<8x2x2xf32, #tpu.memory_space<vmem>>, vector<8x2x2xf32>
    %7 = vector.shape_cast %6 : vector<8x2x2xf32> to vector<16x2xf32>
    %cst = arith.constant dense<0.000000e+00> : vector<16x16xf32>
    %8 = tpu.matmul %7, %0, %cst {dimension_numbers = #tpu.dot_dimension_numbers<[1], [0], [0], [1], [0, 0, 1, 1], [], []>} : vector<16x2xf32>, vector<2x16xf32>, vector<16x16xf32> -> vector<16x16xf32>
    %9 = vector.broadcast %1 : vector<1x16xf32> to vector<16x16xf32>
    %10 = arith.addf %8, %9 : vector<16x16xf32>
    %11 = vector.shape_cast %10 : vector<16x16xf32> to vector<8x2x16xf32>
    %cst_14 = arith.constant 1.000000e+00 : f32
    %12 = vector.broadcast %cst_14 : f32 to vector<2x1xf32>
    %cst_15 = arith.constant 0.000000e+00 : f32
    %13 = vector.broadcast %cst_15 : f32 to vector<2x4xf32>
    %14 = tpu.concatenate %13, %13, %12 in 1 : vector<2x4xf32>, vector<2x4xf32>, vector<2x1xf32> -> vector<2x9xf32>
    %cst_16 = arith.constant dense<0.000000e+00> : vector<2x32xf32>
    %15 = tpu.matmul %14, %2, %cst_16 {dimension_numbers = #tpu.dot_dimension_numbers<[1], [0], [0], [1], [0, 0, 1, 1], [], []>} : vector<2x9xf32>, vector<9x32xf32>, vector<2x32xf32> -> vector<2x32xf32>
    %16 = vector.extract_strided_slice %11 {offsets = [0, 0, 0], sizes = [1, 2, 16], strides = [1, 1, 1]} : vector<8x2x16xf32> to vector<1x2x16xf32>
    %17 = vector.shape_cast %16 : vector<1x2x16xf32> to vector<2x16xf32>
    %18 = vector.extract_strided_slice %15 {offsets = [0, 0], sizes = [2, 16], strides = [1, 1]} : vector<2x32xf32> to vector<2x16xf32>
    %19 = arith.addf %17, %18 : vector<2x16xf32>
    %20 = vector.extract_strided_slice %19 {offsets = [0, 0], sizes = [2, 12], strides = [1, 1]} : vector<2x16xf32> to vector<2x12xf32>
    %21 = arith.negf %20 : vector<2x12xf32>
    %22 = math.exp %21 : vector<2x12xf32>
    %cst_17 = arith.constant 1.000000e+00 : f32
    %23 = vector.broadcast %cst_17 : f32 to vector<2x12xf32>
    %24 = arith.addf %23, %22 : vector<2x12xf32>
    %25 = arith.divf %23, %24 : vector<2x12xf32>
    %26 = vector.extract_strided_slice %25 {offsets = [0, 0], sizes = [2, 4], strides = [1, 1]} : vector<2x12xf32> to vector<2x4xf32>
    %27 = vector.extract_strided_slice %25 {offsets = [0, 4], sizes = [2, 4], strides = [1, 1]} : vector<2x12xf32> to vector<2x4xf32>
    %28 = vector.extract_strided_slice %25 {offsets = [0, 8], sizes = [2, 4], strides = [1, 1]} : vector<2x12xf32> to vector<2x4xf32>
    %29 = vector.extract_strided_slice %19 {offsets = [0, 12], sizes = [2, 4], strides = [1, 1]} : vector<2x16xf32> to vector<2x4xf32>
    %30 = math.tanh %29 : vector<2x4xf32>
    %31 = arith.mulf %27, %13 : vector<2x4xf32>
    %32 = arith.mulf %26, %30 : vector<2x4xf32>
    %33 = arith.addf %31, %32 : vector<2x4xf32>
    %34 = math.tanh %33 : vector<2x4xf32>
    %35 = arith.mulf %28, %34 : vector<2x4xf32>
    %cst_18 = arith.constant dense<0.000000e+00> : vector<2x16xf32>
    %36 = tpu.matmul %35, %3, %cst_18 {dimension_numbers = #tpu.dot_dimension_numbers<[1], [0], [0], [1], [0, 0, 1, 1], [], []>} : vector<2x4xf32>, vector<4x16xf32>, vector<2x16xf32> -> vector<2x16xf32>
    %37 = vector.extract_strided_slice %15 {offsets = [0, 16], sizes = [2, 16], strides = [1, 1]} : vector<2x32xf32> to vector<2x16xf32>
    %38 = arith.addf %36, %37 : vector<2x16xf32>
    %39 = vector.extract_strided_slice %38 {offsets = [0, 0], sizes = [2, 12], strides = [1, 1]} : vector<2x16xf32> to vector<2x12xf32>
    %40 = arith.negf %39 : vector<2x12xf32>
    %41 = math.exp %40 : vector<2x12xf32>
    %cst_19 = arith.constant 1.000000e+00 : f32
    %42 = vector.broadcast %cst_19 : f32 to vector<2x12xf32>
    %43 = arith.addf %42, %41 : vector<2x12xf32>
    %44 = arith.divf %42, %43 : vector<2x12xf32>
    %45 = vector.extract_strided_slice %44 {offsets = [0, 0], sizes = [2, 4], strides = [1, 1]} : vector<2x12xf32> to vector<2x4xf32>
    %46 = vector.extract_strided_slice %44 {offsets = [0, 4], sizes = [2, 4], strides = [1, 1]} : vector<2x12xf32> to vector<2x4xf32>
    %47 = vector.extract_strided_slice %44 {offsets = [0, 8], sizes = [2, 4], strides = [1, 1]} : vector<2x12xf32> to vector<2x4xf32>
    %48 = vector.extract_strided_slice %38 {offsets = [0, 12], sizes = [2, 4], strides = [1, 1]} : vector<2x16xf32> to vector<2x4xf32>
    %49 = math.tanh %48 : vector<2x4xf32>
    %50 = arith.mulf %46, %13 : vector<2x4xf32>
    %51 = arith.mulf %45, %49 : vector<2x4xf32>
    %52 = arith.addf %50, %51 : vector<2x4xf32>
    %53 = math.tanh %52 : vector<2x4xf32>
    %54 = arith.mulf %47, %53 : vector<2x4xf32>
    %55 = tpu.concatenate %35, %54, %12 in 1 : vector<2x4xf32>, vector<2x4xf32>, vector<2x1xf32> -> vector<2x9xf32>
    %cst_20 = arith.constant dense<0.000000e+00> : vector<2x32xf32>
    %56 = tpu.matmul %55, %2, %cst_20 {dimension_numbers = #tpu.dot_dimension_numbers<[1], [0], [0], [1], [0, 0, 1, 1], [], []>} : vector<2x9xf32>, vector<9x32xf32>, vector<2x32xf32> -> vector<2x32xf32>
    %57 = vector.extract_strided_slice %11 {offsets = [1, 0, 0], sizes = [1, 2, 16], strides = [1, 1, 1]} : vector<8x2x16xf32> to vector<1x2x16xf32>
    %58 = vector.shape_cast %57 : vector<1x2x16xf32> to vector<2x16xf32>
    %59 = vector.extract_strided_slice %56 {offsets = [0, 0], sizes = [2, 16], strides = [1, 1]} : vector<2x32xf32> to vector<2x16xf32>
    %60 = arith.addf %58, %59 : vector<2x16xf32>
    %61 = vector.extract_strided_slice %60 {offsets = [0, 0], sizes = [2, 12], strides = [1, 1]} : vector<2x16xf32> to vector<2x12xf32>
    %62 = arith.negf %61 : vector<2x12xf32>
    %63 = math.exp %62 : vector<2x12xf32>
    %cst_21 = arith.constant 1.000000e+00 : f32
    %64 = vector.broadcast %cst_21 : f32 to vector<2x12xf32>
    %65 = arith.addf %64, %63 : vector<2x12xf32>
    %66 = arith.divf %64, %65 : vector<2x12xf32>
    %67 = vector.extract_strided_slice %66 {offsets = [0, 0], sizes = [2, 4], strides = [1, 1]} : vector<2x12xf32> to vector<2x4xf32>
    %68 = vector.extract_strided_slice %66 {offsets = [0, 4], sizes = [2, 4], strides = [1, 1]} : vector<2x12xf32> to vector<2x4xf32>
    %69 = vector.extract_strided_slice %66 {offsets = [0, 8], sizes = [2, 4], strides = [1, 1]} : vector<2x12xf32> to vector<2x4xf32>
    %70 = vector.extract_strided_slice %60 {offsets = [0, 12], sizes = [2, 4], strides = [1, 1]} : vector<2x16xf32> to vector<2x4xf32>
    %71 = math.tanh %70 : vector<2x4xf32>
    %72 = arith.mulf %68, %33 : vector<2x4xf32>
    %73 = arith.mulf %67, %71 : vector<2x4xf32>
    %74 = arith.addf %72, %73 : vector<2x4xf32>
    %75 = math.tanh %74 : vector<2x4xf32>
    %76 = arith.mulf %69, %75 : vector<2x4xf32>
    %cst_22 = arith.constant dense<0.000000e+00> : vector<2x16xf32>
    %77 = tpu.matmul %76, %3, %cst_22 {dimension_numbers = #tpu.dot_dimension_numbers<[1], [0], [0], [1], [0, 0, 1, 1], [], []>} : vector<2x4xf32>, vector<4x16xf32>, vector<2x16xf32> -> vector<2x16xf32>
    %78 = vector.extract_strided_slice %56 {offsets = [0, 16], sizes = [2, 16], strides = [1, 1]} : vector<2x32xf32> to vector<2x16xf32>
    %79 = arith.addf %77, %78 : vector<2x16xf32>
    %80 = vector.extract_strided_slice %79 {offsets = [0, 0], sizes = [2, 12], strides = [1, 1]} : vector<2x16xf32> to vector<2x12xf32>
    %81 = arith.negf %80 : vector<2x12xf32>
    %82 = math.exp %81 : vector<2x12xf32>
    %cst_23 = arith.constant 1.000000e+00 : f32
    %83 = vector.broadcast %cst_23 : f32 to vector<2x12xf32>
    %84 = arith.addf %83, %82 : vector<2x12xf32>
    %85 = arith.divf %83, %84 : vector<2x12xf32>
    %86 = vector.extract_strided_slice %85 {offsets = [0, 0], sizes = [2, 4], strides = [1, 1]} : vector<2x12xf32> to vector<2x4xf32>
    %87 = vector.extract_strided_slice %85 {offsets = [0, 4], sizes = [2, 4], strides = [1, 1]} : vector<2x12xf32> to vector<2x4xf32>
    %88 = vector.extract_strided_slice %85 {offsets = [0, 8], sizes = [2, 4], strides = [1, 1]} : vector<2x12xf32> to vector<2x4xf32>
    %89 = vector.extract_strided_slice %79 {offsets = [0, 12], sizes = [2, 4], strides = [1, 1]} : vector<2x16xf32> to vector<2x4xf32>
    %90 = math.tanh %89 : vector<2x4xf32>
    %91 = arith.mulf %87, %52 : vector<2x4xf32>
    %92 = arith.mulf %86, %90 : vector<2x4xf32>
    %93 = arith.addf %91, %92 : vector<2x4xf32>
    %94 = math.tanh %93 : vector<2x4xf32>
    %95 = arith.mulf %88, %94 : vector<2x4xf32>
    %96 = tpu.concatenate %76, %95, %12 in 1 : vector<2x4xf32>, vector<2x4xf32>, vector<2x1xf32> -> vector<2x9xf32>
    %cst_24 = arith.constant dense<0.000000e+00> : vector<2x32xf32>
    %97 = tpu.matmul %96, %2, %cst_24 {dimension_numbers = #tpu.dot_dimension_numbers<[1], [0], [0], [1], [0, 0, 1, 1], [], []>} : vector<2x9xf32>, vector<9x32xf32>, vector<2x32xf32> -> vector<2x32xf32>
    %98 = vector.extract_strided_slice %11 {offsets = [2, 0, 0], sizes = [1, 2, 16], strides = [1, 1, 1]} : vector<8x2x16xf32> to vector<1x2x16xf32>
    %99 = vector.shape_cast %98 : vector<1x2x16xf32> to vector<2x16xf32>
    %100 = vector.extract_strided_slice %97 {offsets = [0, 0], sizes = [2, 16], strides = [1, 1]} : vector<2x32xf32> to vector<2x16xf32>
    %101 = arith.addf %99, %100 : vector<2x16xf32>
    %102 = vector.extract_strided_slice %101 {offsets = [0, 0], sizes = [2, 12], strides = [1, 1]} : vector<2x16xf32> to vector<2x12xf32>
    %103 = arith.negf %102 : vector<2x12xf32>
    %104 = math.exp %103 : vector<2x12xf32>
    %cst_25 = arith.constant 1.000000e+00 : f32
    %105 = vector.broadcast %cst_25 : f32 to vector<2x12xf32>
    %106 = arith.addf %105, %104 : vector<2x12xf32>
    %107 = arith.divf %105, %106 : vector<2x12xf32>
    %108 = vector.extract_strided_slice %107 {offsets = [0, 0], sizes = [2, 4], strides = [1, 1]} : vector<2x12xf32> to vector<2x4xf32>
    %109 = vector.extract_strided_slice %107 {offsets = [0, 4], sizes = [2, 4], strides = [1, 1]} : vector<2x12xf32> to vector<2x4xf32>
    %110 = vector.extract_strided_slice %107 {offsets = [0, 8], sizes = [2, 4], strides = [1, 1]} : vector<2x12xf32> to vector<2x4xf32>
    %111 = vector.extract_strided_slice %101 {offsets = [0, 12], sizes = [2, 4], strides = [1, 1]} : vector<2x16xf32> to vector<2x4xf32>
    %112 = math.tanh %111 : vector<2x4xf32>
    %113 = arith.mulf %109, %74 : vector<2x4xf32>
    %114 = arith.mulf %108, %112 : vector<2x4xf32>
    %115 = arith.addf %113, %114 : vector<2x4xf32>
    %116 = math.tanh %115 : vector<2x4xf32>
    %117 = arith.mulf %110, %116 : vector<2x4xf32>
    %cst_26 = arith.constant dense<0.000000e+00> : vector<2x16xf32>
    %118 = tpu.matmul %117, %3, %cst_26 {dimension_numbers = #tpu.dot_dimension_numbers<[1], [0], [0], [1], [0, 0, 1, 1], [], []>} : vector<2x4xf32>, vector<4x16xf32>, vector<2x16xf32> -> vector<2x16xf32>
    %119 = vector.extract_strided_slice %97 {offsets = [0, 16], sizes = [2, 16], strides = [1, 1]} : vector<2x32xf32> to vector<2x16xf32>
    %120 = arith.addf %118, %119 : vector<2x16xf32>
    %121 = vector.extract_strided_slice %120 {offsets = [0, 0], sizes = [2, 12], strides = [1, 1]} : vector<2x16xf32> to vector<2x12xf32>
    %122 = arith.negf %121 : vector<2x12xf32>
    %123 = math.exp %122 : vector<2x12xf32>
    %cst_27 = arith.constant 1.000000e+00 : f32
    %124 = vector.broadcast %cst_27 : f32 to vector<2x12xf32>
    %125 = arith.addf %124, %123 : vector<2x12xf32>
    %126 = arith.divf %124, %125 : vector<2x12xf32>
    %127 = vector.extract_strided_slice %126 {offsets = [0, 0], sizes = [2, 4], strides = [1, 1]} : vector<2x12xf32> to vector<2x4xf32>
    %128 = vector.extract_strided_slice %126 {offsets = [0, 4], sizes = [2, 4], strides = [1, 1]} : vector<2x12xf32> to vector<2x4xf32>
    %129 = vector.extract_strided_slice %126 {offsets = [0, 8], sizes = [2, 4], strides = [1, 1]} : vector<2x12xf32> to vector<2x4xf32>
    %130 = vector.extract_strided_slice %120 {offsets = [0, 12], sizes = [2, 4], strides = [1, 1]} : vector<2x16xf32> to vector<2x4xf32>
    %131 = math.tanh %130 : vector<2x4xf32>
    %132 = arith.mulf %128, %93 : vector<2x4xf32>
    %133 = arith.mulf %127, %131 : vector<2x4xf32>
    %134 = arith.addf %132, %133 : vector<2x4xf32>
    %135 = math.tanh %134 : vector<2x4xf32>
    %136 = arith.mulf %129, %135 : vector<2x4xf32>
    %137 = tpu.concatenate %117, %136, %12 in 1 : vector<2x4xf32>, vector<2x4xf32>, vector<2x1xf32> -> vector<2x9xf32>
    %cst_28 = arith.constant dense<0.000000e+00> : vector<2x32xf32>
    %138 = tpu.matmul %137, %2, %cst_28 {dimension_numbers = #tpu.dot_dimension_numbers<[1], [0], [0], [1], [0, 0, 1, 1], [], []>} : vector<2x9xf32>, vector<9x32xf32>, vector<2x32xf32> -> vector<2x32xf32>
    %139 = vector.extract_strided_slice %11 {offsets = [3, 0, 0], sizes = [1, 2, 16], strides = [1, 1, 1]} : vector<8x2x16xf32> to vector<1x2x16xf32>
    %140 = vector.shape_cast %139 : vector<1x2x16xf32> to vector<2x16xf32>
    %141 = vector.extract_strided_slice %138 {offsets = [0, 0], sizes = [2, 16], strides = [1, 1]} : vector<2x32xf32> to vector<2x16xf32>
    %142 = arith.addf %140, %141 : vector<2x16xf32>
    %143 = vector.extract_strided_slice %142 {offsets = [0, 0], sizes = [2, 12], strides = [1, 1]} : vector<2x16xf32> to vector<2x12xf32>
    %144 = arith.negf %143 : vector<2x12xf32>
    %145 = math.exp %144 : vector<2x12xf32>
    %cst_29 = arith.constant 1.000000e+00 : f32
    %146 = vector.broadcast %cst_29 : f32 to vector<2x12xf32>
    %147 = arith.addf %146, %145 : vector<2x12xf32>
    %148 = arith.divf %146, %147 : vector<2x12xf32>
    %149 = vector.extract_strided_slice %148 {offsets = [0, 0], sizes = [2, 4], strides = [1, 1]} : vector<2x12xf32> to vector<2x4xf32>
    %150 = vector.extract_strided_slice %148 {offsets = [0, 4], sizes = [2, 4], strides = [1, 1]} : vector<2x12xf32> to vector<2x4xf32>
    %151 = vector.extract_strided_slice %148 {offsets = [0, 8], sizes = [2, 4], strides = [1, 1]} : vector<2x12xf32> to vector<2x4xf32>
    %152 = vector.extract_strided_slice %142 {offsets = [0, 12], sizes = [2, 4], strides = [1, 1]} : vector<2x16xf32> to vector<2x4xf32>
    %153 = math.tanh %152 : vector<2x4xf32>
    %154 = arith.mulf %150, %115 : vector<2x4xf32>
    %155 = arith.mulf %149, %153 : vector<2x4xf32>
    %156 = arith.addf %154, %155 : vector<2x4xf32>
    %157 = math.tanh %156 : vector<2x4xf32>
    %158 = arith.mulf %151, %157 : vector<2x4xf32>
    %cst_30 = arith.constant dense<0.000000e+00> : vector<2x16xf32>
    %159 = tpu.matmul %158, %3, %cst_30 {dimension_numbers = #tpu.dot_dimension_numbers<[1], [0], [0], [1], [0, 0, 1, 1], [], []>} : vector<2x4xf32>, vector<4x16xf32>, vector<2x16xf32> -> vector<2x16xf32>
    %160 = vector.extract_strided_slice %138 {offsets = [0, 16], sizes = [2, 16], strides = [1, 1]} : vector<2x32xf32> to vector<2x16xf32>
    %161 = arith.addf %159, %160 : vector<2x16xf32>
    %162 = vector.extract_strided_slice %161 {offsets = [0, 0], sizes = [2, 12], strides = [1, 1]} : vector<2x16xf32> to vector<2x12xf32>
    %163 = arith.negf %162 : vector<2x12xf32>
    %164 = math.exp %163 : vector<2x12xf32>
    %cst_31 = arith.constant 1.000000e+00 : f32
    %165 = vector.broadcast %cst_31 : f32 to vector<2x12xf32>
    %166 = arith.addf %165, %164 : vector<2x12xf32>
    %167 = arith.divf %165, %166 : vector<2x12xf32>
    %168 = vector.extract_strided_slice %167 {offsets = [0, 0], sizes = [2, 4], strides = [1, 1]} : vector<2x12xf32> to vector<2x4xf32>
    %169 = vector.extract_strided_slice %167 {offsets = [0, 4], sizes = [2, 4], strides = [1, 1]} : vector<2x12xf32> to vector<2x4xf32>
    %170 = vector.extract_strided_slice %167 {offsets = [0, 8], sizes = [2, 4], strides = [1, 1]} : vector<2x12xf32> to vector<2x4xf32>
    %171 = vector.extract_strided_slice %161 {offsets = [0, 12], sizes = [2, 4], strides = [1, 1]} : vector<2x16xf32> to vector<2x4xf32>
    %172 = math.tanh %171 : vector<2x4xf32>
    %173 = arith.mulf %169, %134 : vector<2x4xf32>
    %174 = arith.mulf %168, %172 : vector<2x4xf32>
    %175 = arith.addf %173, %174 : vector<2x4xf32>
    %176 = math.tanh %175 : vector<2x4xf32>
    %177 = arith.mulf %170, %176 : vector<2x4xf32>
    %178 = tpu.concatenate %158, %177, %12 in 1 : vector<2x4xf32>, vector<2x4xf32>, vector<2x1xf32> -> vector<2x9xf32>
    %cst_32 = arith.constant dense<0.000000e+00> : vector<2x32xf32>
    %179 = tpu.matmul %178, %2, %cst_32 {dimension_numbers = #tpu.dot_dimension_numbers<[1], [0], [0], [1], [0, 0, 1, 1], [], []>} : vector<2x9xf32>, vector<9x32xf32>, vector<2x32xf32> -> vector<2x32xf32>
    %180 = vector.extract_strided_slice %11 {offsets = [4, 0, 0], sizes = [1, 2, 16], strides = [1, 1, 1]} : vector<8x2x16xf32> to vector<1x2x16xf32>
    %181 = vector.shape_cast %180 : vector<1x2x16xf32> to vector<2x16xf32>
    %182 = vector.extract_strided_slice %179 {offsets = [0, 0], sizes = [2, 16], strides = [1, 1]} : vector<2x32xf32> to vector<2x16xf32>
    %183 = arith.addf %181, %182 : vector<2x16xf32>
    %184 = vector.extract_strided_slice %183 {offsets = [0, 0], sizes = [2, 12], strides = [1, 1]} : vector<2x16xf32> to vector<2x12xf32>
    %185 = arith.negf %184 : vector<2x12xf32>
    %186 = math.exp %185 : vector<2x12xf32>
    %cst_33 = arith.constant 1.000000e+00 : f32
    %187 = vector.broadcast %cst_33 : f32 to vector<2x12xf32>
    %188 = arith.addf %187, %186 : vector<2x12xf32>
    %189 = arith.divf %187, %188 : vector<2x12xf32>
    %190 = vector.extract_strided_slice %189 {offsets = [0, 0], sizes = [2, 4], strides = [1, 1]} : vector<2x12xf32> to vector<2x4xf32>
    %191 = vector.extract_strided_slice %189 {offsets = [0, 4], sizes = [2, 4], strides = [1, 1]} : vector<2x12xf32> to vector<2x4xf32>
    %192 = vector.extract_strided_slice %189 {offsets = [0, 8], sizes = [2, 4], strides = [1, 1]} : vector<2x12xf32> to vector<2x4xf32>
    %193 = vector.extract_strided_slice %183 {offsets = [0, 12], sizes = [2, 4], strides = [1, 1]} : vector<2x16xf32> to vector<2x4xf32>
    %194 = math.tanh %193 : vector<2x4xf32>
    %195 = arith.mulf %191, %156 : vector<2x4xf32>
    %196 = arith.mulf %190, %194 : vector<2x4xf32>
    %197 = arith.addf %195, %196 : vector<2x4xf32>
    %198 = math.tanh %197 : vector<2x4xf32>
    %199 = arith.mulf %192, %198 : vector<2x4xf32>
    %cst_34 = arith.constant dense<0.000000e+00> : vector<2x16xf32>
    %200 = tpu.matmul %199, %3, %cst_34 {dimension_numbers = #tpu.dot_dimension_numbers<[1], [0], [0], [1], [0, 0, 1, 1], [], []>} : vector<2x4xf32>, vector<4x16xf32>, vector<2x16xf32> -> vector<2x16xf32>
    %201 = vector.extract_strided_slice %179 {offsets = [0, 16], sizes = [2, 16], strides = [1, 1]} : vector<2x32xf32> to vector<2x16xf32>
    %202 = arith.addf %200, %201 : vector<2x16xf32>
    %203 = vector.extract_strided_slice %202 {offsets = [0, 0], sizes = [2, 12], strides = [1, 1]} : vector<2x16xf32> to vector<2x12xf32>
    %204 = arith.negf %203 : vector<2x12xf32>
    %205 = math.exp %204 : vector<2x12xf32>
    %cst_35 = arith.constant 1.000000e+00 : f32
    %206 = vector.broadcast %cst_35 : f32 to vector<2x12xf32>
    %207 = arith.addf %206, %205 : vector<2x12xf32>
    %208 = arith.divf %206, %207 : vector<2x12xf32>
    %209 = vector.extract_strided_slice %208 {offsets = [0, 0], sizes = [2, 4], strides = [1, 1]} : vector<2x12xf32> to vector<2x4xf32>
    %210 = vector.extract_strided_slice %208 {offsets = [0, 4], sizes = [2, 4], strides = [1, 1]} : vector<2x12xf32> to vector<2x4xf32>
    %211 = vector.extract_strided_slice %208 {offsets = [0, 8], sizes = [2, 4], strides = [1, 1]} : vector<2x12xf32> to vector<2x4xf32>
    %212 = vector.extract_strided_slice %202 {offsets = [0, 12], sizes = [2, 4], strides = [1, 1]} : vector<2x16xf32> to vector<2x4xf32>
    %213 = math.tanh %212 : vector<2x4xf32>
    %214 = arith.mulf %210, %175 : vector<2x4xf32>
    %215 = arith.mulf %209, %213 : vector<2x4xf32>
    %216 = arith.addf %214, %215 : vector<2x4xf32>
    %217 = math.tanh %216 : vector<2x4xf32>
    %218 = arith.mulf %211, %217 : vector<2x4xf32>
    %219 = tpu.concatenate %199, %218, %12 in 1 : vector<2x4xf32>, vector<2x4xf32>, vector<2x1xf32> -> vector<2x9xf32>
    %cst_36 = arith.constant dense<0.000000e+00> : vector<2x32xf32>
    %220 = tpu.matmul %219, %2, %cst_36 {dimension_numbers = #tpu.dot_dimension_numbers<[1], [0], [0], [1], [0, 0, 1, 1], [], []>} : vector<2x9xf32>, vector<9x32xf32>, vector<2x32xf32> -> vector<2x32xf32>
    %221 = vector.extract_strided_slice %11 {offsets = [5, 0, 0], sizes = [1, 2, 16], strides = [1, 1, 1]} : vector<8x2x16xf32> to vector<1x2x16xf32>
    %222 = vector.shape_cast %221 : vector<1x2x16xf32> to vector<2x16xf32>
    %223 = vector.extract_strided_slice %220 {offsets = [0, 0], sizes = [2, 16], strides = [1, 1]} : vector<2x32xf32> to vector<2x16xf32>
    %224 = arith.addf %222, %223 : vector<2x16xf32>
    %225 = vector.extract_strided_slice %224 {offsets = [0, 0], sizes = [2, 12], strides = [1, 1]} : vector<2x16xf32> to vector<2x12xf32>
    %226 = arith.negf %225 : vector<2x12xf32>
    %227 = math.exp %226 : vector<2x12xf32>
    %cst_37 = arith.constant 1.000000e+00 : f32
    %228 = vector.broadcast %cst_37 : f32 to vector<2x12xf32>
    %229 = arith.addf %228, %227 : vector<2x12xf32>
    %230 = arith.divf %228, %229 : vector<2x12xf32>
    %231 = vector.extract_strided_slice %230 {offsets = [0, 0], sizes = [2, 4], strides = [1, 1]} : vector<2x12xf32> to vector<2x4xf32>
    %232 = vector.extract_strided_slice %230 {offsets = [0, 4], sizes = [2, 4], strides = [1, 1]} : vector<2x12xf32> to vector<2x4xf32>
    %233 = vector.extract_strided_slice %230 {offsets = [0, 8], sizes = [2, 4], strides = [1, 1]} : vector<2x12xf32> to vector<2x4xf32>
    %234 = vector.extract_strided_slice %224 {offsets = [0, 12], sizes = [2, 4], strides = [1, 1]} : vector<2x16xf32> to vector<2x4xf32>
    %235 = math.tanh %234 : vector<2x4xf32>
    %236 = arith.mulf %232, %197 : vector<2x4xf32>
    %237 = arith.mulf %231, %235 : vector<2x4xf32>
    %238 = arith.addf %236, %237 : vector<2x4xf32>
    %239 = math.tanh %238 : vector<2x4xf32>
    %240 = arith.mulf %233, %239 : vector<2x4xf32>
    %cst_38 = arith.constant dense<0.000000e+00> : vector<2x16xf32>
    %241 = tpu.matmul %240, %3, %cst_38 {dimension_numbers = #tpu.dot_dimension_numbers<[1], [0], [0], [1], [0, 0, 1, 1], [], []>} : vector<2x4xf32>, vector<4x16xf32>, vector<2x16xf32> -> vector<2x16xf32>
    %242 = vector.extract_strided_slice %220 {offsets = [0, 16], sizes = [2, 16], strides = [1, 1]} : vector<2x32xf32> to vector<2x16xf32>
    %243 = arith.addf %241, %242 : vector<2x16xf32>
    %244 = vector.extract_strided_slice %243 {offsets = [0, 0], sizes = [2, 12], strides = [1, 1]} : vector<2x16xf32> to vector<2x12xf32>
    %245 = arith.negf %244 : vector<2x12xf32>
    %246 = math.exp %245 : vector<2x12xf32>
    %cst_39 = arith.constant 1.000000e+00 : f32
    %247 = vector.broadcast %cst_39 : f32 to vector<2x12xf32>
    %248 = arith.addf %247, %246 : vector<2x12xf32>
    %249 = arith.divf %247, %248 : vector<2x12xf32>
    %250 = vector.extract_strided_slice %249 {offsets = [0, 0], sizes = [2, 4], strides = [1, 1]} : vector<2x12xf32> to vector<2x4xf32>
    %251 = vector.extract_strided_slice %249 {offsets = [0, 4], sizes = [2, 4], strides = [1, 1]} : vector<2x12xf32> to vector<2x4xf32>
    %252 = vector.extract_strided_slice %249 {offsets = [0, 8], sizes = [2, 4], strides = [1, 1]} : vector<2x12xf32> to vector<2x4xf32>
    %253 = vector.extract_strided_slice %243 {offsets = [0, 12], sizes = [2, 4], strides = [1, 1]} : vector<2x16xf32> to vector<2x4xf32>
    %254 = math.tanh %253 : vector<2x4xf32>
    %255 = arith.mulf %251, %216 : vector<2x4xf32>
    %256 = arith.mulf %250, %254 : vector<2x4xf32>
    %257 = arith.addf %255, %256 : vector<2x4xf32>
    %258 = math.tanh %257 : vector<2x4xf32>
    %259 = arith.mulf %252, %258 : vector<2x4xf32>
    %260 = tpu.concatenate %240, %259, %12 in 1 : vector<2x4xf32>, vector<2x4xf32>, vector<2x1xf32> -> vector<2x9xf32>
    %cst_40 = arith.constant dense<0.000000e+00> : vector<2x32xf32>
    %261 = tpu.matmul %260, %2, %cst_40 {dimension_numbers = #tpu.dot_dimension_numbers<[1], [0], [0], [1], [0, 0, 1, 1], [], []>} : vector<2x9xf32>, vector<9x32xf32>, vector<2x32xf32> -> vector<2x32xf32>
    %262 = vector.extract_strided_slice %11 {offsets = [6, 0, 0], sizes = [1, 2, 16], strides = [1, 1, 1]} : vector<8x2x16xf32> to vector<1x2x16xf32>
    %263 = vector.shape_cast %262 : vector<1x2x16xf32> to vector<2x16xf32>
    %264 = vector.extract_strided_slice %261 {offsets = [0, 0], sizes = [2, 16], strides = [1, 1]} : vector<2x32xf32> to vector<2x16xf32>
    %265 = arith.addf %263, %264 : vector<2x16xf32>
    %266 = vector.extract_strided_slice %265 {offsets = [0, 0], sizes = [2, 12], strides = [1, 1]} : vector<2x16xf32> to vector<2x12xf32>
    %267 = arith.negf %266 : vector<2x12xf32>
    %268 = math.exp %267 : vector<2x12xf32>
    %cst_41 = arith.constant 1.000000e+00 : f32
    %269 = vector.broadcast %cst_41 : f32 to vector<2x12xf32>
    %270 = arith.addf %269, %268 : vector<2x12xf32>
    %271 = arith.divf %269, %270 : vector<2x12xf32>
    %272 = vector.extract_strided_slice %271 {offsets = [0, 0], sizes = [2, 4], strides = [1, 1]} : vector<2x12xf32> to vector<2x4xf32>
    %273 = vector.extract_strided_slice %271 {offsets = [0, 4], sizes = [2, 4], strides = [1, 1]} : vector<2x12xf32> to vector<2x4xf32>
    %274 = vector.extract_strided_slice %271 {offsets = [0, 8], sizes = [2, 4], strides = [1, 1]} : vector<2x12xf32> to vector<2x4xf32>
    %275 = vector.extract_strided_slice %265 {offsets = [0, 12], sizes = [2, 4], strides = [1, 1]} : vector<2x16xf32> to vector<2x4xf32>
    %276 = math.tanh %275 : vector<2x4xf32>
    %277 = arith.mulf %273, %238 : vector<2x4xf32>
    %278 = arith.mulf %272, %276 : vector<2x4xf32>
    %279 = arith.addf %277, %278 : vector<2x4xf32>
    %280 = math.tanh %279 : vector<2x4xf32>
    %281 = arith.mulf %274, %280 : vector<2x4xf32>
    %cst_42 = arith.constant dense<0.000000e+00> : vector<2x16xf32>
    %282 = tpu.matmul %281, %3, %cst_42 {dimension_numbers = #tpu.dot_dimension_numbers<[1], [0], [0], [1], [0, 0, 1, 1], [], []>} : vector<2x4xf32>, vector<4x16xf32>, vector<2x16xf32> -> vector<2x16xf32>
    %283 = vector.extract_strided_slice %261 {offsets = [0, 16], sizes = [2, 16], strides = [1, 1]} : vector<2x32xf32> to vector<2x16xf32>
    %284 = arith.addf %282, %283 : vector<2x16xf32>
    %285 = vector.extract_strided_slice %284 {offsets = [0, 0], sizes = [2, 12], strides = [1, 1]} : vector<2x16xf32> to vector<2x12xf32>
    %286 = arith.negf %285 : vector<2x12xf32>
    %287 = math.exp %286 : vector<2x12xf32>
    %cst_43 = arith.constant 1.000000e+00 : f32
    %288 = vector.broadcast %cst_43 : f32 to vector<2x12xf32>
    %289 = arith.addf %288, %287 : vector<2x12xf32>
    %290 = arith.divf %288, %289 : vector<2x12xf32>
    %291 = vector.extract_strided_slice %290 {offsets = [0, 0], sizes = [2, 4], strides = [1, 1]} : vector<2x12xf32> to vector<2x4xf32>
    %292 = vector.extract_strided_slice %290 {offsets = [0, 4], sizes = [2, 4], strides = [1, 1]} : vector<2x12xf32> to vector<2x4xf32>
    %293 = vector.extract_strided_slice %290 {offsets = [0, 8], sizes = [2, 4], strides = [1, 1]} : vector<2x12xf32> to vector<2x4xf32>
    %294 = vector.extract_strided_slice %284 {offsets = [0, 12], sizes = [2, 4], strides = [1, 1]} : vector<2x16xf32> to vector<2x4xf32>
    %295 = math.tanh %294 : vector<2x4xf32>
    %296 = arith.mulf %292, %257 : vector<2x4xf32>
    %297 = arith.mulf %291, %295 : vector<2x4xf32>
    %298 = arith.addf %296, %297 : vector<2x4xf32>
    %299 = math.tanh %298 : vector<2x4xf32>
    %300 = arith.mulf %293, %299 : vector<2x4xf32>
    %301 = tpu.concatenate %281, %300, %12 in 1 : vector<2x4xf32>, vector<2x4xf32>, vector<2x1xf32> -> vector<2x9xf32>
    %cst_44 = arith.constant dense<0.000000e+00> : vector<2x32xf32>
    %302 = tpu.matmul %301, %2, %cst_44 {dimension_numbers = #tpu.dot_dimension_numbers<[1], [0], [0], [1], [0, 0, 1, 1], [], []>} : vector<2x9xf32>, vector<9x32xf32>, vector<2x32xf32> -> vector<2x32xf32>
    %303 = vector.extract_strided_slice %11 {offsets = [7, 0, 0], sizes = [1, 2, 16], strides = [1, 1, 1]} : vector<8x2x16xf32> to vector<1x2x16xf32>
    %304 = vector.shape_cast %303 : vector<1x2x16xf32> to vector<2x16xf32>
    %305 = vector.extract_strided_slice %302 {offsets = [0, 0], sizes = [2, 16], strides = [1, 1]} : vector<2x32xf32> to vector<2x16xf32>
    %306 = arith.addf %304, %305 : vector<2x16xf32>
    %307 = vector.extract_strided_slice %306 {offsets = [0, 0], sizes = [2, 12], strides = [1, 1]} : vector<2x16xf32> to vector<2x12xf32>
    %308 = arith.negf %307 : vector<2x12xf32>
    %309 = math.exp %308 : vector<2x12xf32>
    %cst_45 = arith.constant 1.000000e+00 : f32
    %310 = vector.broadcast %cst_45 : f32 to vector<2x12xf32>
    %311 = arith.addf %310, %309 : vector<2x12xf32>
    %312 = arith.divf %310, %311 : vector<2x12xf32>
    %313 = vector.extract_strided_slice %312 {offsets = [0, 0], sizes = [2, 4], strides = [1, 1]} : vector<2x12xf32> to vector<2x4xf32>
    %314 = vector.extract_strided_slice %312 {offsets = [0, 4], sizes = [2, 4], strides = [1, 1]} : vector<2x12xf32> to vector<2x4xf32>
    %315 = vector.extract_strided_slice %312 {offsets = [0, 8], sizes = [2, 4], strides = [1, 1]} : vector<2x12xf32> to vector<2x4xf32>
    %316 = vector.extract_strided_slice %306 {offsets = [0, 12], sizes = [2, 4], strides = [1, 1]} : vector<2x16xf32> to vector<2x4xf32>
    %317 = math.tanh %316 : vector<2x4xf32>
    %318 = arith.mulf %314, %279 : vector<2x4xf32>
    %319 = arith.mulf %313, %317 : vector<2x4xf32>
    %320 = arith.addf %318, %319 : vector<2x4xf32>
    %321 = math.tanh %320 : vector<2x4xf32>
    %322 = arith.mulf %315, %321 : vector<2x4xf32>
    %cst_46 = arith.constant dense<0.000000e+00> : vector<2x16xf32>
    %323 = tpu.matmul %322, %3, %cst_46 {dimension_numbers = #tpu.dot_dimension_numbers<[1], [0], [0], [1], [0, 0, 1, 1], [], []>} : vector<2x4xf32>, vector<4x16xf32>, vector<2x16xf32> -> vector<2x16xf32>
    %324 = vector.extract_strided_slice %302 {offsets = [0, 16], sizes = [2, 16], strides = [1, 1]} : vector<2x32xf32> to vector<2x16xf32>
    %325 = arith.addf %323, %324 : vector<2x16xf32>
    %326 = vector.extract_strided_slice %325 {offsets = [0, 0], sizes = [2, 12], strides = [1, 1]} : vector<2x16xf32> to vector<2x12xf32>
    %327 = arith.negf %326 : vector<2x12xf32>
    %328 = math.exp %327 : vector<2x12xf32>
    %cst_47 = arith.constant 1.000000e+00 : f32
    %329 = vector.broadcast %cst_47 : f32 to vector<2x12xf32>
    %330 = arith.addf %329, %328 : vector<2x12xf32>
    %331 = arith.divf %329, %330 : vector<2x12xf32>
    %332 = vector.extract_strided_slice %331 {offsets = [0, 0], sizes = [2, 4], strides = [1, 1]} : vector<2x12xf32> to vector<2x4xf32>
    %333 = vector.extract_strided_slice %331 {offsets = [0, 4], sizes = [2, 4], strides = [1, 1]} : vector<2x12xf32> to vector<2x4xf32>
    %334 = vector.extract_strided_slice %331 {offsets = [0, 8], sizes = [2, 4], strides = [1, 1]} : vector<2x12xf32> to vector<2x4xf32>
    %335 = vector.extract_strided_slice %325 {offsets = [0, 12], sizes = [2, 4], strides = [1, 1]} : vector<2x16xf32> to vector<2x4xf32>
    %336 = math.tanh %335 : vector<2x4xf32>
    %337 = arith.mulf %333, %298 : vector<2x4xf32>
    %338 = arith.mulf %332, %336 : vector<2x4xf32>
    %339 = arith.addf %337, %338 : vector<2x4xf32>
    %340 = math.tanh %339 : vector<2x4xf32>
    %341 = arith.mulf %334, %340 : vector<2x4xf32>
    %342 = vector.shape_cast %54 : vector<2x4xf32> to vector<1x2x4xf32>
    %343 = vector.shape_cast %95 : vector<2x4xf32> to vector<1x2x4xf32>
    %344 = vector.shape_cast %136 : vector<2x4xf32> to vector<1x2x4xf32>
    %345 = vector.shape_cast %177 : vector<2x4xf32> to vector<1x2x4xf32>
    %346 = vector.shape_cast %218 : vector<2x4xf32> to vector<1x2x4xf32>
    %347 = vector.shape_cast %259 : vector<2x4xf32> to vector<1x2x4xf32>
    %348 = vector.shape_cast %300 : vector<2x4xf32> to vector<1x2x4xf32>
    %349 = vector.shape_cast %341 : vector<2x4xf32> to vector<1x2x4xf32>
    %350 = tpu.concatenate %342, %343, %344, %345, %346, %347, %348, %349 in 0 : vector<1x2x4xf32>, vector<1x2x4xf32>, vector<1x2x4xf32>, vector<1x2x4xf32>, vector<1x2x4xf32>, vector<1x2x4xf32>, vector<1x2x4xf32>, vector<1x2x4xf32> -> vector<8x2x4xf32>
    %351 = vector.shape_cast %350 : vector<8x2x4xf32> to vector<16x4xf32>
    %cst_48 = arith.constant dense<0.000000e+00> : vector<16x1xf32>
    %352 = tpu.matmul %351, %4, %cst_48 {dimension_numbers = #tpu.dot_dimension_numbers<[1], [0], [0], [1], [0, 0, 1, 1], [], []>} : vector<16x4xf32>, vector<4x1xf32>, vector<16x1xf32> -> vector<16x1xf32>
    %353 = vector.broadcast %5 : vector<1x1xf32> to vector<16x1xf32>
    %354 = arith.addf %352, %353 : vector<16x1xf32>
    %355 = vector.shape_cast %354 : vector<16x1xf32> to vector<8x2x1xf32>
    %c0_49 = arith.constant 0 : index
    %c0_50 = arith.constant 0 : index
    %c0_51 = arith.constant 0 : index
    %356 = vector.load %arg7[%c0_49, %c0_50, %c0_51] : memref<8x2x1xf32, #tpu.memory_space<vmem>>, vector<8x2x1xf32>
    tpu.vector_store %arg7[%c0_49, %c0_50, %c0_51], %355 {strides = array<i32>} : memref<8x2x1xf32, #tpu.memory_space<vmem>>, vector<8x2x1xf32>,
    return
  }
}

</mosaic_0001>

<bundles_post_ra>
// kernel: tpu_custom_call.1
= control target key start
LH: loop header
LB: loop body
LE: loop exit
PB: predicated region body
PF: predicated region fallthrough
CT: control target
= control target key end

     0   :  { %vm96_vm0 = vcmask 1041408   ;;  %v62_v0 = vlaneseq  ;;  %v2507_v4 = vmov 1983009808   ;;  %v2508_v15 = vmov 0.0|0.0   ;;  %s2513_s22 = smov 116   ;;  %s2515_s23 = smov 112   ;;  %s2952_s1 = inlined_call_operand.vmem [shape: f32[2,16], index: 1, kind: input, shape index: {}]   ;;  %s2953_s0 = inlined_call_operand.vmem [shape: f32[8,2,2], index: 0, kind: input, shape index: {}]   ;;  %s2954_s3 = inlined_call_operand.vmem [shape: f32[9,32], index: 3, kind: input, shape index: {}]   ;;  %s2955_s2 = inlined_call_operand.vmem [shape: f32[1,16], index: 2, kind: input, shape index: {}]   ;;  %s2956_s4 = inlined_call_operand.vmem [shape: f32[4,16], index: 4, kind: input, shape index: {}]   ;;  %s2957_s5 = inlined_call_operand.vmem [shape: f32[4,1], index: 5, kind: input, shape index: {}]   ;;  %s2958_s6 = inlined_call_operand.<no memory space> [shape: f32[1,1], index: 6, kind: input, shape index: {}]   ;;  %s2959_s7 = inlined_call_operand.vmem [shape: f32[8,2,1], index: 7, kind: output, shape index: {}]  }
   0x1   :  { %v28_v1 = vld [vmem:[%s2952_s1] sm:$0x3]  ;;  %v36_v3 = vld [vmem:[%s2953_s0 + $0x2] sm:$0x3]  ;;  %v60_v5 = vunpack.c.l.s4 %v2507_v4  ;;  %v37_v6 = vld [vmem:[%s2953_s0 + $0x4] sm:$0x3]  ;;  %2336 = vmatprep.subr.bf16.mxu1 %v2508_v15 }
   0x2   :  { %v35_v2 = vld [vmem:[%s2953_s0] sm:$0x3]  ;;  %2230 = vmatprep.subr.msk.mxu0 %vm96_vm0, %v28_v1  ;;  %v38_v7 = vld [vmem:[%s2953_s0 + $0x6] sm:$0x3]  ;;  %v63_v8 = vshrl.u32 %v62_v0, 7  ;;  %vm225_vm1 = vcmask 1040384  }
   0x3   :  { %2231 = vmatpush3.msk.msra.mxu0 %vm96_vm0, %v28_v1  ;;  %v57_v9 = vcombine.low %v35_v2, %v36_v3  ;;  %v58_v10 = vcombine.low %v37_v6, %v38_v7  ;;  %v61_v11 = vunpack.c.0.s8 %v60_v5  ;;  %v39_v12 = vld [vmem:[%s2953_s0 + $0x8] sm:$0x3]  ;;  %v40_v13 = vld [vmem:[%s2953_s0 + $0xa] sm:$0x3]  ;;  %v41_v14 = vld [vmem:[%s2953_s0 + $0xc] sm:$0x3] }
   0x4   :  { %v42_v16 = vld [vmem:[%s2953_s0 + $0xe] sm:$0x3]  ;;  %v74_v17 = vcombine.low %v39_v12, %v40_v13  ;;  %v30_v18 = vld [vmem:[%s2954_s3] sm:$0xff]  ;;  %v31_v19 = vld [vmem:[%s2954_s3 + $0x8] sm:$0x1]  ;;  %vm2509_vm2 = vmmov 1  }
   0x5   :  { %v2592_v20 = vsub.s32 %v61_v11, %v63_v8  ;;  %v75_v21 = vcombine.low %v41_v14, %v42_v16  ;;  %v2594_v22 = vpack.c.bf16 %v31_v19, %v30_v18  ;;  %vm2596_vm3 = vmpackc.low %vm225_vm1, %vm2509_vm2  ;;  %vm219_vm4 = vcmask 64512   ;;  %v2128_v33 = vld [vmem:[%s2955_s2] ss:$0 sm:$0xff]  ;;  %s2514_s2 = smov 4   ;;  %s2516_s26 = smov 120  }
   0x6   :  { %vm91_vm5 = vcmask 15360   ;;  %vm2510_vm6 = vmmov 0   ;;  %v2511_v28 = vmov 0.0   ;;  %v2512_v29 = vmov 1.0   ;;  %v2642_v52 = vld [vmem:[%s2956_s4] sm:$0xf] }
   0x7   :  { %v65_v24 = vrot.slane %v57_v9, %v2592_v20  ;;  %v72_v25 = vrot.slane %v58_v10, %v2592_v20  ;;  %v82_v26 = vrot.slane %v74_v17, %v2592_v20  ;;  %v89_v27 = vrot.slane %v75_v21, %v2592_v20  ;;  %2339 = vmatpush3.bf16.msk.msra.mxu1 %vm2596_vm3, %v2594_v22  ;;  %s2517_s4 = smov 124  }
   0x8   :  { %2239 = vmatprep.mubr.msk.f32.mxu1 %vm2510_vm6, %v2511_v28  ;;  %v220_v30 = vsel %vm219_vm4, 0.0, %v2512_v29  ;;  %vm221_vm7 = vcmask 72704   ;;  %2242 = vmatprep.subr.mxu0 %v2511_v28  ;;  %vm341_vm8 = vcmask 1043456   ;;  %vm338_vm9 = vcmask 31744  }
   0x9   :  { %v73_v31 = vcombine.low %v65_v24, %v72_v25  ;;  %v90_v32 = vcombine.low %v82_v26, %v89_v27  ;;  %2340 = vmatprep.subr.bf16.mxu1 %v2508_v15  ;;  %vm2115_vm10 = vcmask 1024  }
   0xa   :  { %2240 = vmatmul.mubr.msk.f32.vlgmr.msra.gmra.mrb[0].mxu1 %vm221_vm7, %v220_v30 }
   0xb   :  { %2232 = vmatprep.mubr.msk.f32.mxu0 %vm91_vm5, %v73_v31  ;;  %2343 = vmatpush3.bf16.msk.msra.mxu1 %vm2596_vm3, %v2594_v22 }
   0xc   :  { %2233 = vmatmul.mubr.msk.f32.vlgmr.msra.gmra.mrb[0].mxu0 %vm91_vm5, %v90_v32  ;;  %2251 = vmatprep.mubr.msk.f32.mxu1 %vm2510_vm6, %v2511_v28 }
   0xd   :  { %2244 = vmatprep.mubr.msk.f32.mxu0 %vm2510_vm6, %v2511_v28  ;;  %2344 = vmatprep.subr.bf16.mxu1 %v2508_v15 }
   0xe   :  { %2243 = vmatpush3.msk.msra.mxu0 %vm341_vm8, %v2642_v52 }
   0xf   :  { %2254 = vmatprep.subr.mxu0 %v2511_v28 }
  0xdd   :  { %v295_v34 = vpop.f32.mrb[0].mxu1 }
  0xde   :  { %v2241_v35 = vpop.f32.mrb[1].mxu1 }
  0xdf   :  { %v2234_v36 = vpop.f32.mrb[0].mxu0 }
  0xe0   :  { %v2624_v37 = vadd.f32 %v2234_v36, %v2128_v33  ;;  %v166_v38 = vpop.f32.mrb[1].mxu0 }
  0xe1   :  { %v2626_v39 = vadd.f32 %v2128_v33, %v166_v38 }
  0xe3   :  { %v2630_v40 = vrot.slane %v2626_v39, %v2592_v20 }
  0xe5   :  { %v299_v41 = vadd.f32 %v295_v34, %v2630_v40  ;;  %v192_v14 = vcombine.high %v2630_v40, %v2630_v40 }
  0xe7   :  { %2379 = vtanh.f32 %v299_v41  ;;  %v2134_v43 = vmul.f32 -1.442695, %v299_v41 }
  0xe9   :  { %2381 = vpow2.f32 %v2134_v43 }
  0xf1   :  { %v2380_v42 = vpop.eup %2379 }
  0xf2   :  { %309 = vrot.lane.b32.xlu0 %v2380_v42, %s2513_s22 }
  0xf3   :  { %v2382_v44 = vpop.eup %2381 }
  0xf4   :  { %v303_v45 = vadd.f32 1.0, %v2382_v44 }
  0xf6   :  { %2383 = vrcp.f32 %v303_v45 }
 0x100   :  { %v2384_v46 = vpop.eup %2383 }
 0x101   :  { %v307_v49 = vmul.f32 0.0, %v2384_v46 }
 0x164   :  { %v310_v47 = vpop.permute.xlu0 %309 }
 0x165   :  { %v312_v48 = vmul.f32 %v2384_v46, %v310_v47 }
 0x167   :  { %314 = vrot.lane.b32.xlu0 %v312_v48, %s2514_s2 }
 0x16b   :  { %335 = vrot.lane.b32.xlu0 %v295_v34, %s2515_s23 }
 0x1d9   :  { %v315_v50 = vpop.permute.xlu0 %314 }
 0x1da   :  { %v2636_v51 = vadd.f32 %v315_v50, %v307_v49 }
 0x1dc   :  { %2385 = vtanh.f32 %v2636_v51 }
 0x1dd   :  { %v336_v58 = vpop.permute.xlu0 %335 }
 0x1e6   :  { %v2386_v53 = vpop.eup %2385 }
 0x1e7   :  { %320 = vrot.lane.b32.xlu1 %v2386_v53, %s2514_s2 }
 0x259   :  { %v321_v54 = vpop.permute.xlu1 %320 }
 0x25a   :  { %v323_v55 = vmul.f32 %v2384_v46, %v321_v54 }
 0x25c   :  { %v331_v56 = vrot.slane %v323_v55, %v2592_v20 }
 0x25e   :  { %332 = vrot.lane.b32.xlu1 %v331_v56, %s2516_s26 }
 0x2d0   :  { %v333_v57 = vpop.permute.xlu1 %332 }
 0x2d1   :  { %2245 = vmatmul.mubr.msk.f32.vlgmr.msra.gmra.mrb[2].mxu0 %vm338_vm9, %v333_v57 }
 0x2d2   :  { %2255 = vmatpush3.msk.msra.mxu0 %vm341_vm8, %v2642_v52  ;;  %2256 = vmatprep.mubr.msk.f32.mxu0 %vm2510_vm6, %v2511_v28 }
 0x2d3   :  { %2266 = vmatprep.subr.mxu0 %v2511_v28 }
 0x3a4   :  { %v411_v59 = vpop.f32.mrb[2].mxu0 }
 0x3a5   :  { %v412_v60 = vadd.f32 %v411_v59, %v336_v58  ;;  %v2246_v61 = vpop.f32.mrb[3].mxu0 }
 0x3a6   :  { %v177_v61 = vcombine.high %v2626_v39, %v2626_v39 }
 0x3a7   :  { %2387 = vtanh.f32 %v412_v60  ;;  %v2137_v63 = vmul.f32 -1.442695, %v412_v60 }
 0x3a9   :  { %2389 = vpow2.f32 %v2137_v63 }
 0x3b1   :  { %v2388_v62 = vpop.eup %2387 }
 0x3b2   :  { %424 = vrot.lane.b32.xlu1 %v2388_v62, %s2513_s22  ;;  %v2716_v62 = vrot.slane %v177_v61, %v2592_v20 }
 0x3b3   :  { %v2390_v0 = vpop.eup %2389 }
 0x3b4   :  { %v418_v1 = vadd.f32 1.0, %v2390_v0 }
 0x3b6   :  { %2391 = vrcp.f32 %v418_v1 }
 0x3c0   :  { %v2392_v2 = vpop.eup %2391 }
 0x3c1   :  { %v422_v5 = vmul.f32 0.0, %v2392_v2 }
 0x424   :  { %v425_v3 = vpop.permute.xlu1 %424 }
 0x425   :  { %v427_v4 = vmul.f32 %v2392_v2, %v425_v3 }
 0x427   :  { %429 = vrot.lane.b32.xlu0 %v427_v4, %s2514_s2 }
 0x499   :  { %v430_v6 = vpop.permute.xlu0 %429 }
 0x49a   :  { %v2658_v7 = vadd.f32 %v430_v6, %v422_v5 }
 0x49c   :  { %2393 = vtanh.f32 %v2658_v7 }
 0x4a6   :  { %v2394_v8 = vpop.eup %2393 }
 0x4a7   :  { %435 = vrot.lane.b32.xlu1 %v2394_v8, %s2514_s2 }
 0x519   :  { %v436_v9 = vpop.permute.xlu1 %435 }
 0x51a   :  { %v2662_v10 = vmul.f32 %v2392_v2, %v436_v9 }
 0x51c   :  { %441 = vrot.lane.b32.xlu0 %v2662_v10, %s2517_s4 }
 0x58e   :  { %v442_v11 = vpop.permute.xlu0 %441 }
 0x58f   :  { %v444_v12 = vsel %vm338_vm9, %v333_v57, %v442_v11 }
 0x590   :  { %v445_v13 = vsel %vm219_vm4, %v444_v12, 1.0 }
 0x591   :  { %2252 = vmatmul.mubr.msk.f32.vlgmr.msra.gmra.mrb[2].mxu1 %vm221_vm7, %v445_v13 }
 0x592   :  { %2347 = vmatpush3.bf16.msk.msra.mxu1 %vm2596_vm3, %v2594_v22  ;;  %2263 = vmatprep.mubr.msk.f32.mxu1 %vm2510_vm6, %v2511_v28 }
 0x593   :  { %2348 = vmatprep.subr.bf16.mxu1 %v2508_v15 }
 0x664   :  { %v515_v16 = vpop.f32.mrb[2].mxu1 }
 0x665   :  { %v519_v17 = vadd.f32 %v515_v16, %v192_v14  ;;  %v2253_v18 = vpop.f32.mrb[3].mxu1 }
 0x667   :  { %2395 = vtanh.f32 %v519_v17  ;;  %v2140_v21 = vmul.f32 -1.442695, %v519_v17 }
 0x669   :  { %2397 = vpow2.f32 %v2140_v21 }
 0x671   :  { %v2396_v19 = vpop.eup %2395 }
 0x672   :  { %529 = vrot.lane.b32.xlu1 %v2396_v19, %s2513_s22 }
 0x673   :  { %v2398_v24 = vpop.eup %2397 }
 0x674   :  { %v523_v25 = vadd.f32 1.0, %v2398_v24 }
 0x676   :  { %2399 = vrcp.f32 %v523_v25 }
 0x680   :  { %v2400_v26 = vpop.eup %2399 }
 0x681   :  { %v527_v30 = vmul.f32 %v2400_v26, %v2636_v51 }
 0x6e4   :  { %v530_v27 = vpop.permute.xlu1 %529 }
 0x6e5   :  { %v532_v29 = vmul.f32 %v2400_v26, %v530_v27 }
 0x6e7   :  { %534 = vrot.lane.b32.xlu0 %v532_v29, %s2514_s2 }
 0x759   :  { %v535_v31 = vpop.permute.xlu0 %534 }
 0x75a   :  { %v2680_v32 = vadd.f32 %v535_v31, %v527_v30 }
 0x75c   :  { %2401 = vtanh.f32 %v2680_v32 }
 0x766   :  { %v2402_v33 = vpop.eup %2401 }
 0x767   :  { %540 = vrot.lane.b32.xlu1 %v2402_v33, %s2514_s2 }
 0x76b   :  { %555 = vrot.lane.b32.xlu1 %v515_v16, %s2515_s23 }
 0x7d9   :  { %v541_v34 = vpop.permute.xlu1 %540 }
 0x7da   :  { %v543_v35 = vmul.f32 %v2400_v26, %v541_v34 }
 0x7dc   :  { %v551_v36 = vrot.slane %v543_v35, %v2592_v20 }
 0x7dd   :  { %v556_v40 = vpop.permute.xlu1 %555 }
 0x7de   :  { %552 = vrot.lane.b32.xlu0 %v551_v36, %s2516_s26 }
 0x850   :  { %v553_v38 = vpop.permute.xlu0 %552 }
 0x851   :  { %2257 = vmatmul.mubr.msk.f32.vlgmr.msra.gmra.mrb[4].mxu0 %vm338_vm9, %v553_v38 }
 0x852   :  { %2267 = vmatpush3.msk.msra.mxu0 %vm341_vm8, %v2642_v52  ;;  %2268 = vmatprep.mubr.msk.f32.mxu0 %vm2510_vm6, %v2511_v28 }
 0x853   :  { %2278 = vmatprep.subr.mxu0 %v2511_v28 }
 0x924   :  { %v626_v41 = vpop.f32.mrb[4].mxu0 }
 0x925   :  { %v627_v42 = vadd.f32 %v626_v41, %v556_v40  ;;  %v2258_v43 = vpop.f32.mrb[5].mxu0 }
 0x927   :  { %2403 = vtanh.f32 %v627_v42  ;;  %v2143_v45 = vmul.f32 -1.442695, %v627_v42 }
 0x929   :  { %2405 = vpow2.f32 %v2143_v45 }
 0x931   :  { %v2404_v44 = vpop.eup %2403 }
 0x932   :  { %639 = vrot.lane.b32.xlu0 %v2404_v44, %s2513_s22  ;;  %v193_v44 = vcombine.high %v2716_v62, %v2716_v62 }
 0x933   :  { %v2406_v46 = vpop.eup %2405 }
 0x934   :  { %v633_v47 = vadd.f32 1.0, %v2406_v46 }
 0x936   :  { %2407 = vrcp.f32 %v633_v47 }
 0x940   :  { %v2408_v48 = vpop.eup %2407 }
 0x941   :  { %v637_v51 = vmul.f32 %v2408_v48, %v2658_v7 }
 0x9a4   :  { %v640_v49 = vpop.permute.xlu0 %639 }
 0x9a5   :  { %v642_v50 = vmul.f32 %v2408_v48, %v640_v49 }
 0x9a7   :  { %644 = vrot.lane.b32.xlu1 %v642_v50, %s2514_s2 }
 0xa19   :  { %v645_v53 = vpop.permute.xlu1 %644 }
 0xa1a   :  { %v2696_v54 = vadd.f32 %v645_v53, %v637_v51 }
 0xa1c   :  { %2409 = vtanh.f32 %v2696_v54 }
 0xa26   :  { %v2410_v55 = vpop.eup %2409 }
 0xa27   :  { %650 = vrot.lane.b32.xlu0 %v2410_v55, %s2514_s2 }
 0xa99   :  { %v651_v56 = vpop.permute.xlu0 %650 }
 0xa9a   :  { %v2700_v57 = vmul.f32 %v2408_v48, %v651_v56 }
 0xa9c   :  { %656 = vrot.lane.b32.xlu1 %v2700_v57, %s2517_s4 }
 0xb0e   :  { %v657_v58 = vpop.permute.xlu1 %656 }
 0xb0f   :  { %v659_v59 = vsel %vm338_vm9, %v553_v38, %v657_v58 }
 0xb10   :  { %v660_v60 = vsel %vm219_vm4, %v659_v59, 1.0 }
 0xb11   :  { %2264 = vmatmul.mubr.msk.f32.vlgmr.msra.gmra.mrb[4].mxu1 %vm221_vm7, %v660_v60 }
 0xb12   :  { %2351 = vmatpush3.bf16.msk.msra.mxu1 %vm2596_vm3, %v2594_v22  ;;  %2275 = vmatprep.mubr.msk.f32.mxu1 %vm2510_vm6, %v2511_v28 }
 0xb13   :  { %2352 = vmatprep.subr.bf16.mxu1 %v2508_v15 }
 0xbe4   :  { %v730_v63 = vpop.f32.mrb[4].mxu1 }
 0xbe5   :  { %v734_v0 = vadd.f32 %v730_v63, %v2716_v62  ;;  %v2265_v1 = vpop.f32.mrb[5].mxu1 }
 0xbe7   :  { %2411 = vtanh.f32 %v734_v0  ;;  %v2146_v3 = vmul.f32 -1.442695, %v734_v0 }
 0xbe9   :  { %2413 = vpow2.f32 %v2146_v3 }
 0xbf1   :  { %v2412_v2 = vpop.eup %2411 }
 0xbf2   :  { %744 = vrot.lane.b32.xlu0 %v2412_v2, %s2513_s22 }
 0xbf3   :  { %v2414_v4 = vpop.eup %2413 }
 0xbf4   :  { %v738_v5 = vadd.f32 1.0, %v2414_v4 }
 0xbf6   :  { %2415 = vrcp.f32 %v738_v5 }
 0xc00   :  { %v2416_v6 = vpop.eup %2415 }
 0xc01   :  { %v742_v39 = vmul.f32 %v2416_v6, %v2680_v32 }
 0xc64   :  { %v745_v7 = vpop.permute.xlu0 %744 }
 0xc65   :  { %v747_v8 = vmul.f32 %v2416_v6, %v745_v7 }
 0xc67   :  { %749 = vrot.lane.b32.xlu1 %v747_v8, %s2514_s2 }
 0xcd9   :  { %v750_v9 = vpop.permute.xlu1 %749 }
 0xcda   :  { %v752_v11 = vadd.f32 %v750_v9, %v742_v39 }
 0xcdc   :  { %2417 = vtanh.f32 %v752_v11 }
 0xce6   :  { %v2418_v12 = vpop.eup %2417 }
 0xce7   :  { %755 = vrot.lane.b32.xlu0 %v2418_v12, %s2514_s2 }
 0xceb   :  { %770 = vrot.lane.b32.xlu0 %v730_v63, %s2515_s23 }
 0xd59   :  { %v756_v13 = vpop.permute.xlu0 %755 }
 0xd5a   :  { %v758_v14 = vmul.f32 %v2416_v6, %v756_v13 }
 0xd5c   :  { %v766_v16 = vrot.slane %v758_v14, %v2592_v20 }
 0xd5d   :  { %v771_v18 = vpop.permute.xlu0 %770 }
 0xd5e   :  { %767 = vrot.lane.b32.xlu1 %v766_v16, %s2516_s26 }
 0xdd0   :  { %v768_v17 = vpop.permute.xlu1 %767 }
 0xdd1   :  { %2269 = vmatmul.mubr.msk.f32.vlgmr.msra.gmra.mrb[6].mxu0 %vm338_vm9, %v768_v17 }
 0xdd2   :  { %2279 = vmatpush3.msk.msra.mxu0 %vm341_vm8, %v2642_v52  ;;  %2280 = vmatprep.mubr.msk.f32.mxu0 %vm2510_vm6, %v2511_v28 }
 0xdd3   :  { %2290 = vmatprep.subr.mxu0 %v2511_v28 }
 0xea4   :  { %v841_v19 = vpop.f32.mrb[6].mxu0 }
 0xea5   :  { %v842_v21 = vadd.f32 %v841_v19, %v771_v18  ;;  %v2270_v24 = vpop.f32.mrb[7].mxu0  ;;  %v1951_v18 = vcombine.low %v2662_v10, %v2700_v57  ;;  %v2795_v10 = vrot.slane %v2624_v37, %v2592_v20 }
 0xea7   :  { %2419 = vtanh.f32 %v842_v21  ;;  %v2149_v26 = vmul.f32 -1.442695, %v842_v21  ;;  %v2777_v24 = vrot.slane %v1951_v18, %v2592_v20 }
 0xea9   :  { %2421 = vpow2.f32 %v2149_v26 }
 0xeb1   :  { %v2420_v25 = vpop.eup %2419 }
 0xeb2   :  { %854 = vrot.lane.b32.xlu1 %v2420_v25, %s2513_s22 }
 0xeb3   :  { %v2422_v27 = vpop.eup %2421 }
 0xeb4   :  { %v848_v29 = vadd.f32 1.0, %v2422_v27 }
 0xeb6   :  { %2423 = vrcp.f32 %v848_v29 }
 0xec0   :  { %v2424_v30 = vpop.eup %2423 }
 0xec1   :  { %v852_v33 = vmul.f32 %v2424_v30, %v2696_v54 }
 0xf24   :  { %v855_v31 = vpop.permute.xlu1 %854 }
 0xf25   :  { %v857_v32 = vmul.f32 %v2424_v30, %v855_v31 }
 0xf27   :  { %859 = vrot.lane.b32.xlu0 %v857_v32, %s2514_s2 }
 0xf99   :  { %v860_v34 = vpop.permute.xlu0 %859 }
 0xf9a   :  { %v862_v35 = vadd.f32 %v860_v34, %v852_v33 }
 0xf9c   :  { %2425 = vtanh.f32 %v862_v35 }
 0xfa6   :  { %v2426_v36 = vpop.eup %2425 }
 0xfa7   :  { %865 = vrot.lane.b32.xlu1 %v2426_v36, %s2514_s2 }
0x1019   :  { %v866_v38 = vpop.permute.xlu1 %865 }
0x101a   :  { %v2736_v40 = vmul.f32 %v2424_v30, %v866_v38 }
0x101c   :  { %871 = vrot.lane.b32.xlu0 %v2736_v40, %s2517_s4 }
0x108e   :  { %v872_v41 = vpop.permute.xlu0 %871 }
0x108f   :  { %v874_v42 = vsel %vm338_vm9, %v768_v17, %v872_v41 }
0x1090   :  { %v875_v43 = vsel %vm219_vm4, %v874_v42, 1.0 }
0x1091   :  { %2276 = vmatmul.mubr.msk.f32.vlgmr.msra.gmra.mrb[6].mxu1 %vm221_vm7, %v875_v43 }
0x1092   :  { %2355 = vmatpush3.bf16.msk.msra.mxu1 %vm2596_vm3, %v2594_v22  ;;  %2287 = vmatprep.mubr.msk.f32.mxu1 %vm2510_vm6, %v2511_v28 }
0x1093   :  { %2356 = vmatprep.subr.bf16.mxu1 %v2508_v15 }
0x1164   :  { %v945_v45 = vpop.f32.mrb[6].mxu1 }
0x1165   :  { %v949_v46 = vadd.f32 %v945_v45, %v193_v44  ;;  %v2277_v47 = vpop.f32.mrb[7].mxu1 }
0x1167   :  { %2427 = vtanh.f32 %v949_v46  ;;  %v2152_v49 = vmul.f32 -1.442695, %v949_v46 }
0x1169   :  { %2429 = vpow2.f32 %v2152_v49 }
0x1171   :  { %v2428_v48 = vpop.eup %2427 }
0x1172   :  { %959 = vrot.lane.b32.xlu1 %v2428_v48, %s2513_s22 }
0x1173   :  { %v2430_v50 = vpop.eup %2429 }
0x1174   :  { %v953_v51 = vadd.f32 1.0, %v2430_v50 }
0x1176   :  { %2431 = vrcp.f32 %v953_v51 }
0x1180   :  { %v2432_v53 = vpop.eup %2431 }
0x1181   :  { %v957_v56 = vmul.f32 %v2432_v53, %v752_v11 }
0x11e4   :  { %v960_v54 = vpop.permute.xlu1 %959 }
0x11e5   :  { %v962_v55 = vmul.f32 %v2432_v53, %v960_v54 }
0x11e7   :  { %964 = vrot.lane.b32.xlu0 %v962_v55, %s2514_s2 }
0x1259   :  { %v965_v58 = vpop.permute.xlu0 %964 }
0x125a   :  { %v2753_v59 = vadd.f32 %v965_v58, %v957_v56 }
0x125c   :  { %2433 = vtanh.f32 %v2753_v59 }
0x1266   :  { %v2434_v60 = vpop.eup %2433 }
0x1267   :  { %970 = vrot.lane.b32.xlu1 %v2434_v60, %s2514_s2 }
0x126b   :  { %985 = vrot.lane.b32.xlu1 %v945_v45, %s2515_s23 }
0x12d9   :  { %v971_v61 = vpop.permute.xlu1 %970 }
0x12da   :  { %v973_v62 = vmul.f32 %v2432_v53, %v971_v61 }
0x12dc   :  { %v981_v63 = vrot.slane %v973_v62, %v2592_v20 }
0x12dd   :  { %v986_v1 = vpop.permute.xlu1 %985 }
0x12de   :  { %982 = vrot.lane.b32.xlu0 %v981_v63, %s2516_s26 }
0x1350   :  { %v983_v0 = vpop.permute.xlu0 %982 }
0x1351   :  { %2281 = vmatmul.mubr.msk.f32.vlgmr.msra.gmra.mrb[8].mxu0 %vm338_vm9, %v983_v0 }
0x1352   :  { %2291 = vmatpush3.msk.msra.mxu0 %vm341_vm8, %v2642_v52  ;;  %2292 = vmatprep.mubr.msk.f32.mxu0 %vm2510_vm6, %v2511_v28 }
0x1353   :  { %2302 = vmatprep.subr.mxu0 %v2511_v28 }
0x1424   :  { %v1056_v2 = vpop.f32.mrb[8].mxu0 }
0x1425   :  { %v1057_v3 = vadd.f32 %v1056_v2, %v986_v1  ;;  %v2282_v4 = vpop.f32.mrb[9].mxu0 }
0x1427   :  { %2435 = vtanh.f32 %v1057_v3  ;;  %v2155_v6 = vmul.f32 -1.442695, %v1057_v3 }
0x1429   :  { %2437 = vpow2.f32 %v2155_v6 }
0x1431   :  { %v2436_v5 = vpop.eup %2435 }
0x1432   :  { %1069 = vrot.lane.b32.xlu0 %v2436_v5, %s2513_s22 }
0x1433   :  { %v2438_v7 = vpop.eup %2437 }
0x1434   :  { %v1063_v8 = vadd.f32 1.0, %v2438_v7 }
0x1436   :  { %2439 = vrcp.f32 %v1063_v8  ;;  %v209_v8 = vcombine.high %v2795_v10, %v2795_v10 }
0x1440   :  { %v2440_v39 = vpop.eup %2439 }
0x1441   :  { %v1067_v12 = vmul.f32 %v2440_v39, %v862_v35 }
0x14a4   :  { %v1070_v9 = vpop.permute.xlu0 %1069 }
0x14a5   :  { %v1072_v11 = vmul.f32 %v2440_v39, %v1070_v9 }
0x14a7   :  { %1074 = vrot.lane.b32.xlu1 %v1072_v11, %s2514_s2 }
0x1519   :  { %v1075_v13 = vpop.permute.xlu1 %1074 }
0x151a   :  { %v2768_v14 = vadd.f32 %v1075_v13, %v1067_v12 }
0x151c   :  { %2441 = vtanh.f32 %v2768_v14 }
0x1526   :  { %v2442_v16 = vpop.eup %2441 }
0x1527   :  { %1080 = vrot.lane.b32.xlu0 %v2442_v16, %s2514_s2 }
0x1599   :  { %v1081_v17 = vpop.permute.xlu0 %1080 }
0x159a   :  { %v1083_v19 = vmul.f32 %v2440_v39, %v1081_v17 }
0x159c   :  { %v1952_v21 = vcombine.low %v2736_v40, %v1083_v19  ;;  %1086 = vrot.lane.b32.xlu1 %v1083_v19, %s2517_s4 }
0x159e   :  { %v2780_v25 = vrot.slane %v1952_v21, %v2592_v20 }
0x15a0   :  { %v1967_v26 = vcombine.low %v2777_v24, %v2780_v25  ;;  %v12_v24 = vstv %s2958_s6 }
0x15a1   :  { %13 = vst [vmem:[#allocation2] sm:$0x1] %v12_v24 }
0x160e   :  { %v1087_v27 = vpop.permute.xlu1 %1086 }
0x160f   :  { %v1089_v29 = vsel %vm338_vm9, %v983_v0, %v1087_v27 }
0x1610   :  { %v1090_v30 = vsel %vm219_vm4, %v1089_v29, 1.0 }
0x1611   :  { %2288 = vmatmul.mubr.msk.f32.vlgmr.msra.gmra.mrb[8].mxu1 %vm221_vm7, %v1090_v30 }
0x1612   :  { %2359 = vmatpush3.bf16.msk.msra.mxu1 %vm2596_vm3, %v2594_v22  ;;  %2299 = vmatprep.mubr.msk.f32.mxu1 %vm2510_vm6, %v2511_v28 }
0x1613   :  { %2360 = vmatprep.subr.bf16.mxu1 %v2508_v15 }
0x16e4   :  { %v1160_v57 = vpop.f32.mrb[8].mxu1 }
0x16e5   :  { %v1164_v31 = vadd.f32 %v1160_v57, %v2795_v10  ;;  %v2289_v32 = vpop.f32.mrb[9].mxu1 }
0x16e7   :  { %2443 = vtanh.f32 %v1164_v31  ;;  %v2158_v34 = vmul.f32 -1.442695, %v1164_v31 }
0x16e9   :  { %2445 = vpow2.f32 %v2158_v34 }
0x16f1   :  { %v2444_v33 = vpop.eup %2443 }
0x16f2   :  { %1174 = vrot.lane.b32.xlu0 %v2444_v33, %s2513_s22 }
0x16f3   :  { %v2446_v35 = vpop.eup %2445 }
0x16f4   :  { %v1168_v36 = vadd.f32 1.0, %v2446_v35 }
0x16f6   :  { %2447 = vrcp.f32 %v1168_v36 }
0x1700   :  { %v2448_v38 = vpop.eup %2447 }
0x1701   :  { %v1172_v42 = vmul.f32 %v2448_v38, %v2753_v59 }
0x1764   :  { %v1175_v40 = vpop.permute.xlu0 %1174 }
0x1765   :  { %v1177_v41 = vmul.f32 %v2448_v38, %v1175_v40 }
0x1767   :  { %1179 = vrot.lane.b32.xlu1 %v1177_v41, %s2514_s2 }
0x17d9   :  { %v1180_v43 = vpop.permute.xlu1 %1179 }
0x17da   :  { %v1182_v44 = vadd.f32 %v1180_v43, %v1172_v42 }
0x17dc   :  { %2449 = vtanh.f32 %v1182_v44 }
0x17e6   :  { %v2450_v45 = vpop.eup %2449 }
0x17e7   :  { %1185 = vrot.lane.b32.xlu0 %v2450_v45, %s2514_s2 }
0x17eb   :  { %1200 = vrot.lane.b32.xlu0 %v1160_v57, %s2515_s23 }
0x1859   :  { %v1186_v46 = vpop.permute.xlu0 %1185 }
0x185a   :  { %v1188_v47 = vmul.f32 %v2448_v38, %v1186_v46 }
0x185c   :  { %v1196_v48 = vrot.slane %v1188_v47, %v2592_v20 }
0x185d   :  { %v1201_v50 = vpop.permute.xlu0 %1200 }
0x185e   :  { %1197 = vrot.lane.b32.xlu1 %v1196_v48, %s2516_s26 }
0x18d0   :  { %v1198_v49 = vpop.permute.xlu1 %1197 }
0x18d1   :  { %2293 = vmatmul.mubr.msk.f32.vlgmr.msra.gmra.mrb[10].mxu0 %vm338_vm9, %v1198_v49 }
0x18d2   :  { %2303 = vmatpush3.msk.msra.mxu0 %vm341_vm8, %v2642_v52  ;;  %2304 = vmatprep.mubr.msk.f32.mxu0 %vm2510_vm6, %v2511_v28 }
0x18d3   :  { %2314 = vmatprep.subr.mxu0 %v2511_v28 }
0x19a4   :  { %v1271_v51 = vpop.f32.mrb[10].mxu0 }
0x19a5   :  { %v1272_v53 = vadd.f32 %v1271_v51, %v1201_v50  ;;  %v2294_v54 = vpop.f32.mrb[11].mxu0 }
0x19a7   :  { %2451 = vtanh.f32 %v1272_v53  ;;  %v2161_v56 = vmul.f32 -1.442695, %v1272_v53 }
0x19a9   :  { %2453 = vpow2.f32 %v2161_v56 }
0x19b1   :  { %v2452_v55 = vpop.eup %2451 }
0x19b2   :  { %1284 = vrot.lane.b32.xlu1 %v2452_v55, %s2513_s22  ;;  %v194_v55 = vcombine.high %v2624_v37, %v2624_v37 }
0x19b3   :  { %v2454_v58 = vpop.eup %2453 }
0x19b4   :  { %v1278_v59 = vadd.f32 1.0, %v2454_v58  ;;  %v2860_v56 = vrot.slane %v194_v55, %v2592_v20 }
0x19b6   :  { %2455 = vrcp.f32 %v1278_v59 }
0x19c0   :  { %v2456_v60 = vpop.eup %2455 }
0x19c1   :  { %v1282_v63 = vmul.f32 %v2456_v60, %v2768_v14 }
0x1a24   :  { %v1285_v61 = vpop.permute.xlu1 %1284 }
0x1a25   :  { %v1287_v62 = vmul.f32 %v2456_v60, %v1285_v61 }
0x1a27   :  { %1289 = vrot.lane.b32.xlu0 %v1287_v62, %s2514_s2 }
0x1a99   :  { %v1290_v0 = vpop.permute.xlu0 %1289 }
0x1a9a   :  { %v1292_v1 = vadd.f32 %v1290_v0, %v1282_v63 }
0x1a9c   :  { %2457 = vtanh.f32 %v1292_v1 }
0x1aa6   :  { %v2458_v2 = vpop.eup %2457 }
0x1aa7   :  { %1295 = vrot.lane.b32.xlu1 %v2458_v2, %s2514_s2 }
0x1b19   :  { %v1296_v3 = vpop.permute.xlu1 %1295 }
0x1b1a   :  { %v2815_v4 = vmul.f32 %v2456_v60, %v1296_v3 }
0x1b1c   :  { %1301 = vrot.lane.b32.xlu0 %v2815_v4, %s2517_s4 }
0x1b8e   :  { %v1302_v5 = vpop.permute.xlu0 %1301 }
0x1b8f   :  { %v1304_v6 = vsel %vm338_vm9, %v1198_v49, %v1302_v5 }
0x1b90   :  { %v1305_v7 = vsel %vm219_vm4, %v1304_v6, 1.0 }
0x1b91   :  { %2300 = vmatmul.mubr.msk.f32.vlgmr.msra.gmra.mrb[10].mxu1 %vm221_vm7, %v1305_v7 }
0x1b92   :  { %2363 = vmatpush3.bf16.msk.msra.mxu1 %vm2596_vm3, %v2594_v22  ;;  %2311 = vmatprep.mubr.msk.f32.mxu1 %vm2510_vm6, %v2511_v28 }
0x1b93   :  { %2364 = vmatprep.subr.bf16.mxu1 %v2508_v15 }
0x1c64   :  { %v1375_v39 = vpop.f32.mrb[10].mxu1 }
0x1c65   :  { %v1379_v9 = vadd.f32 %v1375_v39, %v209_v8  ;;  %v2301_v11 = vpop.f32.mrb[11].mxu1 }
0x1c67   :  { %2459 = vtanh.f32 %v1379_v9  ;;  %v2164_v13 = vmul.f32 -1.442695, %v1379_v9 }
0x1c69   :  { %2461 = vpow2.f32 %v2164_v13 }
0x1c71   :  { %v2460_v12 = vpop.eup %2459 }
0x1c72   :  { %1389 = vrot.lane.b32.xlu1 %v2460_v12, %s2513_s22 }
0x1c73   :  { %v2462_v14 = vpop.eup %2461 }
0x1c74   :  { %v1383_v16 = vadd.f32 1.0, %v2462_v14 }
0x1c76   :  { %2463 = vrcp.f32 %v1383_v16 }
0x1c80   :  { %v2464_v17 = vpop.eup %2463 }
0x1c81   :  { %v1387_v15 = vmul.f32 %v2464_v17, %v1182_v44 }
0x1ce4   :  { %v1390_v18 = vpop.permute.xlu1 %1389 }
0x1ce5   :  { %v1392_v19 = vmul.f32 %v2464_v17, %v1390_v18 }
0x1ce7   :  { %1394 = vrot.lane.b32.xlu0 %v1392_v19, %s2514_s2 }
0x1d59   :  { %v1395_v21 = vpop.permute.xlu0 %1394 }
0x1d5a   :  { %v1397_v27 = vadd.f32 %v1395_v21, %v1387_v15 }
0x1d5c   :  { %2465 = vtanh.f32 %v1397_v27 }
0x1d66   :  { %v2466_v29 = vpop.eup %2465 }
0x1d67   :  { %1400 = vrot.lane.b32.xlu1 %v2466_v29, %s2514_s2 }
0x1d6b   :  { %1415 = vrot.lane.b32.xlu1 %v1375_v39, %s2515_s23 }
0x1dd9   :  { %v1401_v30 = vpop.permute.xlu1 %1400 }
0x1dda   :  { %v1403_v10 = vmul.f32 %v2464_v17, %v1401_v30 }
0x1ddc   :  { %v1411_v57 = vrot.slane %v1403_v10, %v2592_v20 }
0x1ddd   :  { %v1416_v32 = vpop.permute.xlu1 %1415 }
0x1dde   :  { %1412 = vrot.lane.b32.xlu0 %v1411_v57, %s2516_s26 }
0x1e50   :  { %v1413_v31 = vpop.permute.xlu0 %1412 }
0x1e51   :  { %2305 = vmatmul.mubr.msk.f32.vlgmr.msra.gmra.mrb[12].mxu0 %vm338_vm9, %v1413_v31 }
0x1e52   :  { %2315 = vmatpush3.msk.msra.mxu0 %vm341_vm8, %v2642_v52  ;;  %2316 = vmatprep.mubr.msk.f32.mxu0 %vm2510_vm6, %v2511_v28 }
0x1e53   :  { %2326 = vmatprep.subr.mxu0 %v2511_v28 }
0x1f24   :  { %v1486_v33 = vpop.f32.mrb[12].mxu0 }
0x1f25   :  { %v1487_v34 = vadd.f32 %v1486_v33, %v1416_v32  ;;  %v2306_v35 = vpop.f32.mrb[13].mxu0  ;;  %v210_v33 = vcombine.high %v2860_v56, %v2860_v56 }
0x1f27   :  { %2467 = vtanh.f32 %v1487_v34  ;;  %v2167_v38 = vmul.f32 -1.442695, %v1487_v34 }
0x1f29   :  { %2469 = vpow2.f32 %v2167_v38 }
0x1f31   :  { %v2468_v36 = vpop.eup %2467 }
0x1f32   :  { %1499 = vrot.lane.b32.xlu0 %v2468_v36, %s2513_s22 }
0x1f33   :  { %v2470_v40 = vpop.eup %2469 }
0x1f34   :  { %v1493_v41 = vadd.f32 1.0, %v2470_v40 }
0x1f36   :  { %2471 = vrcp.f32 %v1493_v41 }
0x1f40   :  { %v2472_v42 = vpop.eup %2471 }
0x1f41   :  { %v1497_v45 = vmul.f32 %v2472_v42, %v1292_v1 }
0x1fa4   :  { %v1500_v43 = vpop.permute.xlu0 %1499 }
0x1fa5   :  { %v1502_v44 = vmul.f32 %v2472_v42, %v1500_v43 }
0x1fa7   :  { %1504 = vrot.lane.b32.xlu1 %v1502_v44, %s2514_s2 }
0x2019   :  { %v1505_v46 = vpop.permute.xlu1 %1504 }
0x201a   :  { %v1507_v47 = vadd.f32 %v1505_v46, %v1497_v45 }
0x201c   :  { %2473 = vtanh.f32 %v1507_v47 }
0x2026   :  { %v2474_v48 = vpop.eup %2473 }
0x2027   :  { %1510 = vrot.lane.b32.xlu0 %v2474_v48, %s2514_s2 }
0x2099   :  { %v1511_v49 = vpop.permute.xlu0 %1510 }
0x209a   :  { %v2845_v50 = vmul.f32 %v2472_v42, %v1511_v49 }
0x209c   :  { %1516 = vrot.lane.b32.xlu1 %v2845_v50, %s2517_s4 }
0x210e   :  { %v1517_v51 = vpop.permute.xlu1 %1516 }
0x210f   :  { %v1519_v53 = vsel %vm338_vm9, %v1413_v31, %v1517_v51 }
0x2110   :  { %v1520_v54 = vsel %vm219_vm4, %v1519_v53, 1.0 }
0x2111   :  { %2312 = vmatmul.mubr.msk.f32.vlgmr.msra.gmra.mrb[12].mxu1 %vm221_vm7, %v1520_v54 }
0x2112   :  { %2367 = vmatpush3.bf16.msk.msra.mxu1 %vm2596_vm3, %v2594_v22  ;;  %2323 = vmatprep.mubr.msk.f32.mxu1 %vm2510_vm6, %v2511_v28 }
0x21e4   :  { %v1590_v58 = vpop.f32.mrb[12].mxu1 }
0x21e5   :  { %v1594_v59 = vadd.f32 %v1590_v58, %v2860_v56  ;;  %v2313_v60 = vpop.f32.mrb[13].mxu1 }
0x21e7   :  { %2475 = vtanh.f32 %v1594_v59  ;;  %v2170_v62 = vmul.f32 -1.442695, %v1594_v59 }
0x21e9   :  { %2477 = vpow2.f32 %v2170_v62 }
0x21f1   :  { %v2476_v61 = vpop.eup %2475 }
0x21f2   :  { %1604 = vrot.lane.b32.xlu0 %v2476_v61, %s2513_s22 }
0x21f3   :  { %v2478_v22 = vpop.eup %2477 }
0x21f4   :  { %v1598_v23 = vadd.f32 1.0, %v2478_v22 }
0x21f6   :  { %2479 = vrcp.f32 %v1598_v23 }
0x2200   :  { %v2480_v63 = vpop.eup %2479 }
0x2201   :  { %v1602_v37 = vmul.f32 %v2480_v63, %v1397_v27 }
0x2264   :  { %v1605_v0 = vpop.permute.xlu0 %1604 }
0x2265   :  { %v1607_v1 = vmul.f32 %v2480_v63, %v1605_v0 }
0x2267   :  { %1609 = vrot.lane.b32.xlu1 %v1607_v1, %s2514_s2 }
0x22d9   :  { %v1610_v2 = vpop.permute.xlu1 %1609 }
0x22da   :  { %v1612_v3 = vadd.f32 %v1610_v2, %v1602_v37 }
0x22dc   :  { %2481 = vtanh.f32 %v1612_v3 }
0x22e6   :  { %v2482_v5 = vpop.eup %2481 }
0x22e7   :  { %1615 = vrot.lane.b32.xlu0 %v2482_v5, %s2514_s2 }
0x22eb   :  { %1630 = vrot.lane.b32.xlu0 %v1590_v58, %s2515_s23 }
0x2359   :  { %v1616_v6 = vpop.permute.xlu0 %1615 }
0x235a   :  { %v1618_v7 = vmul.f32 %v2480_v63, %v1616_v6  ;;  %v33_v6 = vld [vmem:[%s2957_s5] sm:$0xf] }
0x235b   :  { %2331 = vmatprep.subr.msk.mxu1 %vm341_vm8, %v33_v6 }
0x235c   :  { %v1626_v8 = vrot.slane %v1618_v7, %v2592_v20 }
0x235d   :  { %v1631_v9 = vpop.permute.xlu0 %1630 }
0x235e   :  { %1627 = vrot.lane.b32.xlu1 %v1626_v8, %s2516_s26 }
0x23d0   :  { %v1628_v39 = vpop.permute.xlu1 %1627 }
0x23d1   :  { %2317 = vmatmul.mubr.msk.f32.vlgmr.msra.gmra.mrb[14].mxu0 %vm338_vm9, %v1628_v39 }
0x23d2   :  { %2327 = vmatpush3.msk.msra.mxu0 %vm341_vm8, %v2642_v52  ;;  %2328 = vmatprep.mubr.msk.f32.mxu0 %vm2510_vm6, %v2511_v28 }
0x24a4   :  { %v1701_v11 = vpop.f32.mrb[14].mxu0 }
0x24a5   :  { %v1702_v12 = vadd.f32 %v1701_v11, %v1631_v9  ;;  %v2318_v13 = vpop.f32.mrb[15].mxu0 }
0x24a7   :  { %2483 = vtanh.f32 %v1702_v12  ;;  %v2173_v16 = vmul.f32 -1.442695, %v1702_v12 }
0x24a9   :  { %2485 = vpow2.f32 %v2173_v16 }
0x24b1   :  { %v2484_v14 = vpop.eup %2483 }
0x24b2   :  { %1714 = vrot.lane.b32.xlu1 %v2484_v14, %s2513_s22  ;;  %v2180_v14 = vld [vmem:[#allocation2] ss:$0 sm:$0xff] }
0x24b3   :  { %v2486_v17 = vpop.eup %2485 }
0x24b4   :  { %v1708_v18 = vadd.f32 1.0, %v2486_v17 }
0x24b6   :  { %2487 = vrcp.f32 %v1708_v18 }
0x24c0   :  { %v2488_v19 = vpop.eup %2487 }
0x24c1   :  { %v1712_v52 = vmul.f32 %v2488_v19, %v1507_v47 }
0x2524   :  { %v1715_v15 = vpop.permute.xlu1 %1714 }
0x2525   :  { %v1717_v21 = vmul.f32 %v2488_v19, %v1715_v15 }
0x2527   :  { %1719 = vrot.lane.b32.xlu0 %v1717_v21, %s2514_s2 }
0x2599   :  { %v1720_v28 = vpop.permute.xlu0 %1719 }
0x259a   :  { %v1722_v27 = vadd.f32 %v1720_v28, %v1712_v52 }
0x259c   :  { %2489 = vtanh.f32 %v1722_v27 }
0x25a6   :  { %v2490_v29 = vpop.eup %2489 }
0x25a7   :  { %1725 = vrot.lane.b32.xlu1 %v2490_v29, %s2514_s2 }
0x2619   :  { %v1726_v30 = vpop.permute.xlu1 %1725 }
0x261a   :  { %v2877_v10 = vmul.f32 %v2488_v19, %v1726_v30 }
0x261c   :  { %1731 = vrot.lane.b32.xlu0 %v2877_v10, %s2517_s4 }
0x268e   :  { %v1732_v57 = vpop.permute.xlu0 %1731 }
0x268f   :  { %v1734_v31 = vsel %vm338_vm9, %v1628_v39, %v1732_v57 }
0x2690   :  { %v1735_v32 = vsel %vm219_vm4, %v1734_v31, 1.0 }
0x2691   :  { %2324 = vmatmul.mubr.msk.f32.vlgmr.msra.gmra.mrb[14].mxu1 %vm221_vm7, %v1735_v32 }
0x2692   :  { %2332 = vmatpush3.msk.msra.mxu1 %vm341_vm8, %v33_v6 }
0x2764   :  { %v1805_v34 = vpop.f32.mrb[14].mxu1 }
0x2765   :  { %v1809_v35 = vadd.f32 %v1805_v34, %v210_v33  ;;  %v2325_v36 = vpop.f32.mrb[15].mxu1 }
0x2767   :  { %2491 = vtanh.f32 %v1809_v35  ;;  %v2176_v40 = vmul.f32 -1.442695, %v1809_v35 }
0x2769   :  { %2493 = vpow2.f32 %v2176_v40 }
0x2771   :  { %v2492_v38 = vpop.eup %2491 }
0x2772   :  { %1819 = vrot.lane.b32.xlu1 %v2492_v38, %s2513_s22 }
0x2773   :  { %v2494_v41 = vpop.eup %2493 }
0x2774   :  { %v1813_v42 = vadd.f32 1.0, %v2494_v41 }
0x2776   :  { %2495 = vrcp.f32 %v1813_v42 }
0x2780   :  { %v2496_v43 = vpop.eup %2495 }
0x2781   :  { %v1817_v46 = vmul.f32 %v2496_v43, %v1612_v3 }
0x27e4   :  { %v1820_v44 = vpop.permute.xlu1 %1819 }
0x27e5   :  { %v1822_v45 = vmul.f32 %v2496_v43, %v1820_v44 }
0x27e7   :  { %1824 = vrot.lane.b32.xlu0 %v1822_v45, %s2514_s2 }
0x2859   :  { %v1825_v47 = vpop.permute.xlu0 %1824 }
0x285a   :  { %v1827_v48 = vadd.f32 %v1825_v47, %v1817_v46 }
0x285c   :  { %2497 = vtanh.f32 %v1827_v48 }
0x2866   :  { %v2498_v49 = vpop.eup %2497 }
0x2867   :  { %1830 = vrot.lane.b32.xlu1 %v2498_v49, %s2514_s2 }
0x286b   :  { %1845 = vrot.lane.b32.xlu1 %v1805_v34, %s2515_s23 }
0x28d9   :  { %v1831_v51 = vpop.permute.xlu1 %1830 }
0x28da   :  { %v1833_v53 = vmul.f32 %v2496_v43, %v1831_v51 }
0x28dc   :  { %v1841_v54 = vrot.slane %v1833_v53, %v2592_v20 }
0x28dd   :  { %v1846_v56 = vpop.permute.xlu1 %1845 }
0x28de   :  { %1842 = vrot.lane.b32.xlu0 %v1841_v54, %s2516_s26 }
0x2950   :  { %v1843_v55 = vpop.permute.xlu0 %1842 }
0x2951   :  { %2329 = vmatmul.mubr.msk.f32.vlgmr.msra.gmra.mrb[16].mxu0 %vm338_vm9, %v1843_v55 }
0x2a24   :  { %v1916_v58 = vpop.f32.mrb[16].mxu0 }
0x2a25   :  { %v1917_v59 = vadd.f32 %v1916_v58, %v1846_v56  ;;  %v2330_v60 = vpop.f32.mrb[17].mxu0 }
0x2a27   :  { %2499 = vtanh.f32 %v1917_v59  ;;  %v2179_v62 = vmul.f32 -1.442695, %v1917_v59 }
0x2a29   :  { %2501 = vpow2.f32 %v2179_v62 }
0x2a31   :  { %v2500_v61 = vpop.eup %2499 }
0x2a32   :  { %1929 = vrot.lane.b32.xlu0 %v2500_v61, %s2513_s22 }
0x2a33   :  { %v2502_v22 = vpop.eup %2501 }
0x2a34   :  { %v1923_v23 = vadd.f32 1.0, %v2502_v22 }
0x2a36   :  { %2503 = vrcp.f32 %v1923_v23 }
0x2a40   :  { %v2504_v63 = vpop.eup %2503 }
0x2a41   :  { %v1927_v37 = vmul.f32 %v2504_v63, %v1722_v27 }
0x2aa4   :  { %v1930_v0 = vpop.permute.xlu0 %1929 }
0x2aa5   :  { %v1932_v1 = vmul.f32 %v2504_v63, %v1930_v0 }
0x2aa7   :  { %1934 = vrot.lane.b32.xlu1 %v1932_v1, %s2514_s2 }
0x2aab   :  { %1985 = vrot.lane.b32.xlu1 %v1967_v26, %s2516_s26  ;;  %v1968_v26 = vcombine.low %v2815_v4, %v2845_v50 }
0x2aad   :  { %v1976_v9 = vrot.slane %v1968_v26, %v2592_v20 }
0x2b19   :  { %v1935_v2 = vpop.permute.xlu1 %1934 }
0x2b1a   :  { %v1937_v3 = vadd.f32 %v1935_v2, %v1927_v37 }
0x2b1c   :  { %2505 = vtanh.f32 %v1937_v3 }
0x2b1d   :  { %v1986_v5 = vpop.permute.xlu1 %1985 }
0x2b1e   :  { %2333 = vmatprep.mubr.msk.f32.mxu1 %vm338_vm9, %v1986_v5 }
0x2b26   :  { %v2506_v7 = vpop.eup %2505 }
0x2b27   :  { %1940 = vrot.lane.b32.xlu0 %v2506_v7, %s2514_s2 }
0x2b99   :  { %v1941_v25 = vpop.permute.xlu0 %1940 }
0x2b9a   :  { %v1943_v8 = vmul.f32 %v2504_v63, %v1941_v25 }
0x2b9c   :  { %v1969_v39 = vcombine.low %v2877_v10, %v1943_v8 }
0x2b9e   :  { %v1983_v11 = vrot.slane %v1969_v39, %v2592_v20 }
0x2ba0   :  { %v1984_v12 = vcombine.low %v1976_v9, %v1983_v11 }
0x2ba2   :  { %1987 = vrot.lane.b32.xlu0 %v1984_v12, %s2516_s26 }
0x2c14   :  { %v1988_v13 = vpop.permute.xlu0 %1987 }
0x2c15   :  { %2334 = vmatmul.mubr.msk.f32.vlgmr.msra.gmra.mrb[16].mxu1 %vm338_vm9, %v1988_v13 }
0x2ce8   :  { %v2335_v16 = vpop.f32.mrb[16].mxu1 }
0x2ce9   :  { %v2068_v17 = vadd.f32 %v2335_v16, %v2180_v14  ;;  %v2062_v18 = vpop.f32.mrb[17].mxu1 }
0x2cea   :  { %v2063_v19 = vadd.f32 %v2180_v14, %v2062_v18 }
0x2ceb   :  { %v2090_v4 = vcombine.high %v2068_v17, %v2068_v17  ;;  %v2097_v50 = vrot.slane %v2068_v17, %v2592_v20 }
0x2cec   :  { %v2073_v15 = vcombine.high %v2063_v19, %v2063_v19  ;;  %v2080_v21 = vrot.slane %v2063_v19, %v2592_v20 }
0x2ced   :  { %v2104_v52 = vrot.slane %v2090_v4, %v2592_v20  ;;  %v2105_v28 = vcombine.high %v2097_v50, %v2097_v50  ;;  %2120 = vst.msk [vmem:[%s2959_s7 + $0x8] sm:$0x3] %vm2115_vm10, %v2097_v50 }
0x2cee   :  { %v2087_v27 = vrot.slane %v2073_v15, %v2592_v20  ;;  %v2088_v29 = vcombine.high %v2080_v21, %v2080_v21  ;;  %2116 = vst.msk [vmem:[%s2959_s7] sm:$0x3] %vm2115_vm10, %v2080_v21 }
0x2cef   :  { %v2106_v30 = vcombine.high %v2104_v52, %v2104_v52  ;;  %2121 = vst.msk [vmem:[%s2959_s7 + $0xa] sm:$0x3] %vm2115_vm10, %v2105_v28  ;;  %2122 = vst.msk [vmem:[%s2959_s7 + $0xc] sm:$0x3] %vm2115_vm10, %v2104_v52 }
0x2cf0   :  { %v2089_v10 = vcombine.high %v2087_v27, %v2087_v27  ;;  %2117 = vst.msk [vmem:[%s2959_s7 + $0x2] sm:$0x3] %vm2115_vm10, %v2088_v29  ;;  %2118 = vst.msk [vmem:[%s2959_s7 + $0x4] sm:$0x3] %vm2115_vm10, %v2087_v27 }
0x2cf1   :  { %2123 = vst.msk [vmem:[%s2959_s7 + $0xe] sm:$0x3] %vm2115_vm10, %v2106_v30 }
0x2cf2   :  { %2119 = vst.msk [vmem:[%s2959_s7 + $0x6] sm:$0x3] %vm2115_vm10, %v2089_v10 }

</bundles_post_ra>
